<compile_context>
chip_gen: v7x
topology: tpu7x:2x2x1
jax: 0.10.0
libtpu: 0.0.40
codegen_flags: <defaults>
</compile_context>

<pallas_src>
import functools

import jax
import jax.numpy as jnp
from jax import lax
from jax.experimental import pallas as pl
from jax.experimental.pallas import tpu as pltpu

INPUT_DIM = 3
AUX_DIM = 4
HIDDEN = 20          # true hidden size of the model
HP = 32              # padded hidden size (gate blocks 32 lanes wide)
FP = 8               # padded per-direction input features (7 real + 1 bias lane == 1.0)
OUT_LANES = 128      # lane-dense output tile width (holds up to 128 time steps)

# ---- slab row offsets (all sub-blocks start on multiples of 8 sublanes) ----
# slab256 (80, 256):
_W1IN_R0 = 0         # (16, 256) fused layer-1 input weights; biases in rows 7 / 15
_W1HH_R0 = 16        # (64, 256) fused block-diagonal layer-1 recurrent weights
_S256_ROWS = 80
# slab128 (152, 128):
_W2IN_R0 = 0         # (64, 128) layer-2 input weights (fwd rows 0:32, bwd rows 32:64)
_W2HH_R0 = 64        # (32, 128) layer-2 recurrent weights
_W3IN_R0 = 96        # (32, 128) layer-3 input weights
_B2_R = 128          # (1, 128)  layer-2 bias
_B3_R = 136          # (1, 128)  layer-3 bias
_W3HH_R = 144        # (1, 128)  layer-3 recurrent weights (single hidden unit)
_S128_ROWS = 152


def model_kernel(x_ref, w256_ref, w128_ref, out_ref, h1_ref, h2_ref, *, T, BP):
    # x_ref:   (T*BP, 16)   row block s = [x(s), 1.0, x(T-1-s), 1.0] (features padded)
    # out_ref: (BP, 128)    lane t holds the post-ReLU CollectLSTM output at time t
    # h1_ref:  (T*BP, 64)   layer-1 hidden sequence, lanes 0:32 fwd / 32:64 bwd
    # h2_ref:  (T*BP, 32)   layer-2 hidden sequence
    f32 = jnp.float32

    x = x_ref[...]                                          # (T*BP, 2*FP)
    w1_in = w256_ref[_W1IN_R0:_W1IN_R0 + 2 * FP, :]         # (16, 256)
    w1_hh = w256_ref[_W1HH_R0:_W1HH_R0 + 2 * HP, :]         # (64, 256)
    w2_in = w128_ref[_W2IN_R0:_W2IN_R0 + 2 * HP, :]         # (64, 128)
    w2_hh = w128_ref[_W2HH_R0:_W2HH_R0 + HP, :]             # (32, 128)
    w3_in = w128_ref[_W3IN_R0:_W3IN_R0 + HP, :]             # (32, 128)
    b2 = w128_ref[_B2_R:_B2_R + 1, :]                       # (1, 128)
    b3 = w128_ref[_B3_R:_B3_R + 1, :]                       # (1, 128)
    w3_hh = w128_ref[_W3HH_R:_W3HH_R + 1, :]                # (1, 128)

    # ---- layer 1: hoisted input projection (biases ride the 1.0 lanes 7 / 15) ----
    z1_all = jnp.dot(x, w1_in, preferred_element_type=f32)  # (T*BP, 256)

    # fused bidirectional recurrence: one MXU matmul, one sigmoid, one tanh per step
    h1 = jnp.zeros((BP, 2 * HP), f32)                       # [h_fwd | h_bwd]
    c1 = jnp.zeros((BP, 2 * HP), f32)
    for s in range(T):
        tb = T - 1 - s
        z = z1_all[s * BP:(s + 1) * BP, :] + jnp.dot(h1, w1_hh, preferred_element_type=f32)
        sig = jax.nn.sigmoid(z[:, 0:6 * HP])                # i_f,i_b,f_f,f_b,o_f,o_b
        g = jnp.tanh(z[:, 6 * HP:8 * HP])                   # g_f,g_b
        i = sig[:, 0:2 * HP]
        f = sig[:, 2 * HP:4 * HP]
        o = sig[:, 4 * HP:6 * HP]
        c1 = f * c1 + i * g
        h1 = o * jnp.tanh(c1)
        # fwd half belongs to time s, bwd half to time T-1-s (stores are off the
        # recurrence chain; two 32-lane stores since the time indices differ)
        h1_ref[s * BP:(s + 1) * BP, 0:HP] = h1[:, 0:HP]
        h1_ref[tb * BP:(tb + 1) * BP, HP:2 * HP] = h1[:, HP:2 * HP]

    # ---- layer 2: single hoisted input projection over the merged (fwd|bwd) scratch ----
    z2_all = jnp.dot(h1_ref[...], w2_in, preferred_element_type=f32) + b2   # (T*BP, 128)
    h2 = jnp.zeros((BP, HP), f32)
    c2 = jnp.zeros((BP, HP), f32)
    for t in range(T):
        z = z2_all[t * BP:(t + 1) * BP, :] + jnp.dot(h2, w2_hh, preferred_element_type=f32)
        sig = jax.nn.sigmoid(z[:, 0:3 * HP])
        g = jnp.tanh(z[:, 3 * HP:4 * HP])
        c2 = sig[:, HP:2 * HP] * c2 + sig[:, 0:HP] * g
        h2 = sig[:, 2 * HP:3 * HP] * jnp.tanh(c2)
        h2_ref[t * BP:(t + 1) * BP, :] = h2

    # ---- layer 3: CollectLSTM (true hidden = 1) + ReLU ----
    # recurrent term is a VPU outer product (h3 scalar * weight row) -- no MXU on chain
    z3_all = jnp.dot(h2_ref[...], w3_in, preferred_element_type=f32) + b3   # (T*BP, 128)
    lane_ids = lax.broadcasted_iota(jnp.int32, (BP, OUT_LANES), 1)
    out_acc = jnp.zeros((BP, OUT_LANES), f32)
    h3 = jnp.zeros((BP, HP), f32)
    c3 = jnp.zeros((BP, HP), f32)
    for t in range(T):
        z = z3_all[t * BP:(t + 1) * BP, :] + h3[:, 0:1] * w3_hh             # (BP, 128)
        sig = jax.nn.sigmoid(z[:, 0:3 * HP])
        g = jnp.tanh(z[:, 3 * HP:4 * HP])
        c3 = sig[:, HP:2 * HP] * c3 + sig[:, 0:HP] * g
        h3 = sig[:, 2 * HP:3 * HP] * jnp.tanh(c3)
        val = jnp.broadcast_to(jnp.maximum(h3[:, 0:1], 0.0), (BP, OUT_LANES))
        out_acc = jnp.where(lane_ids == t, val, out_acc)
    out_ref[...] = out_acc                                   # one dense (BP,128) store


# ---------------- one-time weight preparation (run OUTSIDE the jitted forward) ----------------
def _scatter(dst, w, row0, gw, col_i, col_f, col_o, col_g):
    """Place the torch-gate-order (i, f, g, o) blocks of w (rows, 4*gw) into dst at
    the given column offsets (i.e. reordered to (i, f, o, g) and zero-padded)."""
    r = w.shape[0]
    dst = dst.at[row0:row0 + r, col_i:col_i + gw].set(w[:, 0 * gw:1 * gw])
    dst = dst.at[row0:row0 + r, col_f:col_f + gw].set(w[:, 1 * gw:2 * gw])
    dst = dst.at[row0:row0 + r, col_g:col_g + gw].set(w[:, 2 * gw:3 * gw])
    dst = dst.at[row0:row0 + r, col_o:col_o + gw].set(w[:, 3 * gw:4 * gw])
    return dst


def prepare_params(params):
    """Gate reorder, fwd/bwd fusion, zero padding and packing into two slabs.
    NOTE: padded lanes MUST stay zero (see padded-lane invariant at top of file)."""
    H = HIDDEN
    f32 = jnp.float32
    FWD = dict(col_i=0 * HP, col_f=2 * HP, col_o=4 * HP, col_g=6 * HP)   # fused 256-wide layout
    BWD = dict(col_i=1 * HP, col_f=3 * HP, col_o=5 * HP, col_g=7 * HP)
    G128 = dict(col_i=0 * HP, col_f=1 * HP, col_o=2 * HP, col_g=3 * HP)  # plain 128-wide layout

    s256 = jnp.zeros((_S256_ROWS, 8 * HP), f32)
    # fused layer-1 input projection: rows 0:8 act on x(s), rows 8:16 act on x(T-1-s)
    s256 = _scatter(s256, params["wih_f"], _W1IN_R0 + 0, H, **FWD)
    s256 = _scatter(s256, params["b_f"], _W1IN_R0 + FP - 1, H, **FWD)       # rides x lane 7 == 1.0
    s256 = _scatter(s256, params["wih_b"], _W1IN_R0 + FP, H, **BWD)
    s256 = _scatter(s256, params["b_b"], _W1IN_R0 + 2 * FP - 1, H, **BWD)   # rides x lane 15 == 1.0
    # fused block-diagonal layer-1 recurrent weights
    s256 = _scatter(s256, params["whh_f"], _W1HH_R0 + 0, H, **FWD)
    s256 = _scatter(s256, params["whh_b"], _W1HH_R0 + HP, H, **BWD)

    s128 = jnp.zeros((_S128_ROWS, 4 * HP), f32)
    s128 = _scatter(s128, params["wih_2"][:H, :], _W2IN_R0 + 0, H, **G128)  # fwd-hidden rows
    s128 = _scatter(s128, params["wih_2"][H:, :], _W2IN_R0 + HP, H, **G128) # bwd-hidden rows
    s128 = _scatter(s128, params["whh_2"], _W2HH_R0, H, **G128)
    s128 = _scatter(s128, params["wih_3"], _W3IN_R0, 1, **G128)
    s128 = _scatter(s128, params["b_2"], _B2_R, H, **G128)
    s128 = _scatter(s128, params["b_3"], _B3_R, 1, **G128)
    s128 = _scatter(s128, params["whh_3"], _W3HH_R, 1, **G128)
    return s256, s128


def init_params(key, input_dim=INPUT_DIM, aux_dim=AUX_DIM, hidden=HIDDEN):
    """Deterministic synthetic weights, PyTorch-style U(-1/sqrt(H), 1/sqrt(H)).
    Stored pre-transposed as (fan_in, 4*hidden), torch gate order (i, f, g, o),
    b = b_ih + b_hh folded."""
    in_dim = input_dim + aux_dim

    def uni(k, shape, fan):
        lim = 1.0 / jnp.sqrt(jnp.float32(fan))
        return jax.random.uniform(k, shape, jnp.float32, -lim, lim)

    ks = jax.random.split(key, 12)
    return {
        "wih_f": uni(ks[0], (in_dim, 4 * hidden), hidden),
        "whh_f": uni(ks[1], (hidden, 4 * hidden), hidden),
        "b_f":   uni(ks[2], (1, 4 * hidden), hidden),
        "wih_b": uni(ks[3], (in_dim, 4 * hidden), hidden),
        "whh_b": uni(ks[4], (hidden, 4 * hidden), hidden),
        "b_b":   uni(ks[5], (1, 4 * hidden), hidden),
        "wih_2": uni(ks[6], (2 * hidden, 4 * hidden), hidden),
        "whh_2": uni(ks[7], (hidden, 4 * hidden), hidden),
        "b_2":   uni(ks[8], (1, 4 * hidden), hidden),
        "wih_3": uni(ks[9], (hidden, 4 * 1), 1),
        "whh_3": uni(ks[10], (1, 4 * 1), 1),
        "b_3":   uni(ks[11], (1, 4 * 1), 1),
    }


@jax.jit
def model_forward(trace, aux, slab256, slab128):
    """trace: (B, T, INPUT_DIM), aux: (B, AUX_DIM), prepped slabs -> (B, T, 1).
    Equivalent to Model_1_4.forward(trace, aux, Unnorm=False)."""
    B, T, _ = trace.shape
    assert T <= OUT_LANES  # TODO(synk): add a time-tile grid axis for T > 128
    BP = max(8, ((B + 7) // 8) * 8)

    aux2 = aux.reshape(B, AUX_DIM)                                      # aux.squeeze()
    aux_tiled = jnp.broadcast_to(aux2[:, None, :], (B, T, AUX_DIM))     # .unsqueeze(1).repeat
    ones = jnp.ones((B, T, 1), jnp.float32)                             # bias lane (== lane 7)
    x = jnp.concatenate([trace.astype(jnp.float32),
                         aux_tiled.astype(jnp.float32), ones], axis=-1)  # (B, T, FP)
    x = jnp.pad(x, ((0, BP - B), (0, 0), (0, 0)))                        # padded batch rows all-zero
    x_tm = jnp.transpose(x, (1, 0, 2))                                   # (T, BP, FP) time-major
    # row block s = [x(s) | x(T-1-s)] so the fused layer-1 projection is ONE matmul
    x_comb = jnp.concatenate([x_tm, x_tm[::-1]], axis=-1).reshape(T * BP, 2 * FP)

    kernel = functools.partial(model_kernel, T=T, BP=BP)
    out = pl.pallas_call(
        kernel,
        out_shape=jax.ShapeDtypeStruct((BP, OUT_LANES), jnp.float32),
        in_specs=[pl.BlockSpec(memory_space=pltpu.MemorySpace.VMEM)] * 3,
        out_specs=pl.BlockSpec(memory_space=pltpu.MemorySpace.VMEM),
        scratch_shapes=[pltpu.VMEM((T * BP, 2 * HP), jnp.float32),   # layer-1 hidden (fwd|bwd)
                        pltpu.VMEM((T * BP, HP), jnp.float32)],      # layer-2 hidden
    )(x_comb, slab256, slab128)

    return out[:B, :T][..., None]                                    # (B, T, 1)


# ---------------- pure-JAX reference (for correctness check) ----------------
def _lstm_layer_ref(x, w_ih, w_hh, b, H, reverse=False):
    B = x.shape[0]

    def step(carry, x_t):
        h, c = carry
        z = x_t @ w_ih + h @ w_hh + b
        i = jax.nn.sigmoid(z[:, 0:H])
        f = jax.nn.sigmoid(z[:, H:2 * H])
        g = jnp.tanh(z[:, 2 * H:3 * H])
        o = jax.nn.sigmoid(z[:, 3 * H:4 * H])
        c = f * c + i * g
        h = o * jnp.tanh(c)
        return (h, c), h

    xs = jnp.transpose(x, (1, 0, 2))
    if reverse:
        xs = xs[::-1]
    _, hs = lax.scan(step, (jnp.zeros((B, H)), jnp.zeros((B, H))), xs)
    if reverse:
        hs = hs[::-1]
    return jnp.transpose(hs, (1, 0, 2))


def model_forward_ref(trace, aux, params):
    B, T, _ = trace.shape
    aux_tiled = jnp.broadcast_to(aux.reshape(B, AUX_DIM)[:, None, :], (B, T, AUX_DIM))
    x = jnp.concatenate([trace, aux_tiled], axis=-1)
    fwd = _lstm_layer_ref(x, params["wih_f"], params["whh_f"], params["b_f"], HIDDEN)
    bwd = _lstm_layer_ref(x, params["wih_b"], params["whh_b"], params["b_b"], HIDDEN, reverse=True)
    h1 = jnp.concatenate([fwd, bwd], axis=-1)
    h2 = _lstm_layer_ref(h1, params["wih_2"], params["whh_2"], params["b_2"], HIDDEN)
    h3 = _lstm_layer_ref(h2, params["wih_3"], params["whh_3"], params["b_3"], 1)
    return jnp.maximum(h3, 0.0)


if __name__ == "__main__":
    key = jax.random.PRNGKey(0)
    k_trace, k_aux, k_par = jax.random.split(key, 3)

    B, T = 2, 8
    trace = jax.random.normal(k_trace, (B, T, INPUT_DIM), jnp.float32)
    aux = jax.random.normal(k_aux, (B, AUX_DIM), jnp.float32)
    params = init_params(k_par)

    # one-time weight prep, hoisted out of the per-call jitted forward
    slab256, slab128 = prepare_params(params)
    slab256 = jax.block_until_ready(slab256)
    slab128 = jax.block_until_ready(slab128)

    out = jax.block_until_ready(model_forward(trace, aux, slab256, slab128))
    ref = jax.block_until_ready(model_forward_ref(trace, aux, params))

    assert out.shape == (B, T, 1), out.shape
    assert bool(jnp.all(jnp.isfinite(out)))
    max_err = float(jnp.max(jnp.abs(out - ref)))
    assert max_err < 2e-3, f"max abs error vs reference: {max_err}"
    print("KERNEL_OK")
</pallas_src>

<mosaic_0001>
module attributes {stable_mosaic.version = 11 : i64} {
  func.func @model_kernel(%arg0: memref<64x16xf32, #tpu.memory_space<vmem>>, %arg1: memref<80x256xf32, #tpu.memory_space<vmem>>, %arg2: memref<152x128xf32, #tpu.memory_space<vmem>>, %arg3: memref<8x128xf32, #tpu.memory_space<vmem>>, %arg4: memref<64x64xf32, #tpu.memory_space<vmem>>, %arg5: memref<64x32xf32, #tpu.memory_space<vmem>>) attributes {dimension_semantics = [], scalar_prefetch = 0 : i64, scratch_operands = 2 : i64, tpu.core_type = #tpu.core_type<tc>} {
    %c0 = arith.constant 0 : index
    %c0_0 = arith.constant 0 : index
    %0 = vector.load %arg0[%c0, %c0_0] : memref<64x16xf32, #tpu.memory_space<vmem>>, vector<64x16xf32>
    %c0_1 = arith.constant 0 : index
    %c0_2 = arith.constant 0 : index
    %1 = vector.load %arg1[%c0_1, %c0_2] : memref<80x256xf32, #tpu.memory_space<vmem>>, vector<16x256xf32>
    %c16 = arith.constant 16 : index
    %c0_3 = arith.constant 0 : index
    %2 = vector.load %arg1[%c16, %c0_3] : memref<80x256xf32, #tpu.memory_space<vmem>>, vector<64x256xf32>
    %c0_4 = arith.constant 0 : index
    %c0_5 = arith.constant 0 : index
    %3 = vector.load %arg2[%c0_4, %c0_5] : memref<152x128xf32, #tpu.memory_space<vmem>>, vector<64x128xf32>
    %c64 = arith.constant 64 : index
    %c0_6 = arith.constant 0 : index
    %4 = vector.load %arg2[%c64, %c0_6] : memref<152x128xf32, #tpu.memory_space<vmem>>, vector<32x128xf32>
    %c96 = arith.constant 96 : index
    %c0_7 = arith.constant 0 : index
    %5 = vector.load %arg2[%c96, %c0_7] : memref<152x128xf32, #tpu.memory_space<vmem>>, vector<32x128xf32>
    %c128 = arith.constant 128 : index
    %c0_8 = arith.constant 0 : index
    %6 = vector.load %arg2[%c128, %c0_8] : memref<152x128xf32, #tpu.memory_space<vmem>>, vector<1x128xf32>
    %c136 = arith.constant 136 : index
    %c0_9 = arith.constant 0 : index
    %7 = vector.load %arg2[%c136, %c0_9] : memref<152x128xf32, #tpu.memory_space<vmem>>, vector<1x128xf32>
    %c144 = arith.constant 144 : index
    %c0_10 = arith.constant 0 : index
    %8 = vector.load %arg2[%c144, %c0_10] : memref<152x128xf32, #tpu.memory_space<vmem>>, vector<1x128xf32>
    %cst = arith.constant dense<0.000000e+00> : vector<64x256xf32>
    %9 = tpu.matmul %0, %1, %cst {dimension_numbers = #tpu.dot_dimension_numbers<[1], [0], [0], [1], [0, 0, 1, 1], [], []>} : vector<64x16xf32>, vector<16x256xf32>, vector<64x256xf32> -> vector<64x256xf32>
    %cst_11 = arith.constant 0.000000e+00 : f32
    %10 = vector.broadcast %cst_11 : f32 to vector<8x64xf32>
    %cst_12 = arith.constant 0.000000e+00 : f32
    %11 = vector.broadcast %cst_12 : f32 to vector<8x64xf32>
    %12 = vector.extract_strided_slice %9 {offsets = [0, 0], sizes = [8, 256], strides = [1, 1]} : vector<64x256xf32> to vector<8x256xf32>
    %cst_13 = arith.constant dense<0.000000e+00> : vector<8x256xf32>
    %13 = tpu.matmul %10, %2, %cst_13 {dimension_numbers = #tpu.dot_dimension_numbers<[1], [0], [0], [1], [0, 0, 1, 1], [], []>} : vector<8x64xf32>, vector<64x256xf32>, vector<8x256xf32> -> vector<8x256xf32>
    %14 = arith.addf %12, %13 : vector<8x256xf32>
    %15 = vector.extract_strided_slice %14 {offsets = [0, 0], sizes = [8, 192], strides = [1, 1]} : vector<8x256xf32> to vector<8x192xf32>
    %16 = arith.negf %15 : vector<8x192xf32>
    %17 = math.exp %16 : vector<8x192xf32>
    %cst_14 = arith.constant 1.000000e+00 : f32
    %18 = vector.broadcast %cst_14 : f32 to vector<8x192xf32>
    %19 = arith.addf %18, %17 : vector<8x192xf32>
    %20 = arith.divf %18, %19 : vector<8x192xf32>
    %21 = vector.extract_strided_slice %14 {offsets = [0, 192], sizes = [8, 64], strides = [1, 1]} : vector<8x256xf32> to vector<8x64xf32>
    %22 = math.tanh %21 : vector<8x64xf32>
    %23 = vector.extract_strided_slice %20 {offsets = [0, 0], sizes = [8, 64], strides = [1, 1]} : vector<8x192xf32> to vector<8x64xf32>
    %24 = vector.extract_strided_slice %20 {offsets = [0, 64], sizes = [8, 64], strides = [1, 1]} : vector<8x192xf32> to vector<8x64xf32>
    %25 = vector.extract_strided_slice %20 {offsets = [0, 128], sizes = [8, 64], strides = [1, 1]} : vector<8x192xf32> to vector<8x64xf32>
    %26 = arith.mulf %24, %11 : vector<8x64xf32>
    %27 = arith.mulf %23, %22 : vector<8x64xf32>
    %28 = arith.addf %26, %27 : vector<8x64xf32>
    %29 = math.tanh %28 : vector<8x64xf32>
    %30 = arith.mulf %25, %29 : vector<8x64xf32>
    %31 = vector.extract_strided_slice %30 {offsets = [0, 0], sizes = [8, 32], strides = [1, 1]} : vector<8x64xf32> to vector<8x32xf32>
    %c0_15 = arith.constant 0 : index
    %c0_16 = arith.constant 0 : index
    %32 = vector.load %arg4[%c0_15, %c0_16] : memref<64x64xf32, #tpu.memory_space<vmem>>, vector<8x32xf32>
    tpu.vector_store %arg4[%c0_15, %c0_16], %31 {strides = array<i32>} : memref<64x64xf32, #tpu.memory_space<vmem>>, vector<8x32xf32>,
    %33 = vector.extract_strided_slice %30 {offsets = [0, 32], sizes = [8, 32], strides = [1, 1]} : vector<8x64xf32> to vector<8x32xf32>
    %c56 = arith.constant 56 : index
    %c32 = arith.constant 32 : index
    %34 = vector.load %arg4[%c56, %c32] : memref<64x64xf32, #tpu.memory_space<vmem>>, vector<8x32xf32>
    tpu.vector_store %arg4[%c56, %c32], %33 {strides = array<i32>} : memref<64x64xf32, #tpu.memory_space<vmem>>, vector<8x32xf32>,
    %35 = vector.extract_strided_slice %9 {offsets = [8, 0], sizes = [8, 256], strides = [1, 1]} : vector<64x256xf32> to vector<8x256xf32>
    %cst_17 = arith.constant dense<0.000000e+00> : vector<8x256xf32>
    %36 = tpu.matmul %30, %2, %cst_17 {dimension_numbers = #tpu.dot_dimension_numbers<[1], [0], [0], [1], [0, 0, 1, 1], [], []>} : vector<8x64xf32>, vector<64x256xf32>, vector<8x256xf32> -> vector<8x256xf32>
    %37 = arith.addf %35, %36 : vector<8x256xf32>
    %38 = vector.extract_strided_slice %37 {offsets = [0, 0], sizes = [8, 192], strides = [1, 1]} : vector<8x256xf32> to vector<8x192xf32>
    %39 = arith.negf %38 : vector<8x192xf32>
    %40 = math.exp %39 : vector<8x192xf32>
    %cst_18 = arith.constant 1.000000e+00 : f32
    %41 = vector.broadcast %cst_18 : f32 to vector<8x192xf32>
    %42 = arith.addf %41, %40 : vector<8x192xf32>
    %43 = arith.divf %41, %42 : vector<8x192xf32>
    %44 = vector.extract_strided_slice %37 {offsets = [0, 192], sizes = [8, 64], strides = [1, 1]} : vector<8x256xf32> to vector<8x64xf32>
    %45 = math.tanh %44 : vector<8x64xf32>
    %46 = vector.extract_strided_slice %43 {offsets = [0, 0], sizes = [8, 64], strides = [1, 1]} : vector<8x192xf32> to vector<8x64xf32>
    %47 = vector.extract_strided_slice %43 {offsets = [0, 64], sizes = [8, 64], strides = [1, 1]} : vector<8x192xf32> to vector<8x64xf32>
    %48 = vector.extract_strided_slice %43 {offsets = [0, 128], sizes = [8, 64], strides = [1, 1]} : vector<8x192xf32> to vector<8x64xf32>
    %49 = arith.mulf %47, %28 : vector<8x64xf32>
    %50 = arith.mulf %46, %45 : vector<8x64xf32>
    %51 = arith.addf %49, %50 : vector<8x64xf32>
    %52 = math.tanh %51 : vector<8x64xf32>
    %53 = arith.mulf %48, %52 : vector<8x64xf32>
    %54 = vector.extract_strided_slice %53 {offsets = [0, 0], sizes = [8, 32], strides = [1, 1]} : vector<8x64xf32> to vector<8x32xf32>
    %c8 = arith.constant 8 : index
    %c0_19 = arith.constant 0 : index
    %55 = vector.load %arg4[%c8, %c0_19] : memref<64x64xf32, #tpu.memory_space<vmem>>, vector<8x32xf32>
    tpu.vector_store %arg4[%c8, %c0_19], %54 {strides = array<i32>} : memref<64x64xf32, #tpu.memory_space<vmem>>, vector<8x32xf32>,
    %56 = vector.extract_strided_slice %53 {offsets = [0, 32], sizes = [8, 32], strides = [1, 1]} : vector<8x64xf32> to vector<8x32xf32>
    %c48 = arith.constant 48 : index
    %c32_20 = arith.constant 32 : index
    %57 = vector.load %arg4[%c48, %c32_20] : memref<64x64xf32, #tpu.memory_space<vmem>>, vector<8x32xf32>
    tpu.vector_store %arg4[%c48, %c32_20], %56 {strides = array<i32>} : memref<64x64xf32, #tpu.memory_space<vmem>>, vector<8x32xf32>,
    %58 = vector.extract_strided_slice %9 {offsets = [16, 0], sizes = [8, 256], strides = [1, 1]} : vector<64x256xf32> to vector<8x256xf32>
    %cst_21 = arith.constant dense<0.000000e+00> : vector<8x256xf32>
    %59 = tpu.matmul %53, %2, %cst_21 {dimension_numbers = #tpu.dot_dimension_numbers<[1], [0], [0], [1], [0, 0, 1, 1], [], []>} : vector<8x64xf32>, vector<64x256xf32>, vector<8x256xf32> -> vector<8x256xf32>
    %60 = arith.addf %58, %59 : vector<8x256xf32>
    %61 = vector.extract_strided_slice %60 {offsets = [0, 0], sizes = [8, 192], strides = [1, 1]} : vector<8x256xf32> to vector<8x192xf32>
    %62 = arith.negf %61 : vector<8x192xf32>
    %63 = math.exp %62 : vector<8x192xf32>
    %cst_22 = arith.constant 1.000000e+00 : f32
    %64 = vector.broadcast %cst_22 : f32 to vector<8x192xf32>
    %65 = arith.addf %64, %63 : vector<8x192xf32>
    %66 = arith.divf %64, %65 : vector<8x192xf32>
    %67 = vector.extract_strided_slice %60 {offsets = [0, 192], sizes = [8, 64], strides = [1, 1]} : vector<8x256xf32> to vector<8x64xf32>
    %68 = math.tanh %67 : vector<8x64xf32>
    %69 = vector.extract_strided_slice %66 {offsets = [0, 0], sizes = [8, 64], strides = [1, 1]} : vector<8x192xf32> to vector<8x64xf32>
    %70 = vector.extract_strided_slice %66 {offsets = [0, 64], sizes = [8, 64], strides = [1, 1]} : vector<8x192xf32> to vector<8x64xf32>
    %71 = vector.extract_strided_slice %66 {offsets = [0, 128], sizes = [8, 64], strides = [1, 1]} : vector<8x192xf32> to vector<8x64xf32>
    %72 = arith.mulf %70, %51 : vector<8x64xf32>
    %73 = arith.mulf %69, %68 : vector<8x64xf32>
    %74 = arith.addf %72, %73 : vector<8x64xf32>
    %75 = math.tanh %74 : vector<8x64xf32>
    %76 = arith.mulf %71, %75 : vector<8x64xf32>
    %77 = vector.extract_strided_slice %76 {offsets = [0, 0], sizes = [8, 32], strides = [1, 1]} : vector<8x64xf32> to vector<8x32xf32>
    %c16_23 = arith.constant 16 : index
    %c0_24 = arith.constant 0 : index
    %78 = vector.load %arg4[%c16_23, %c0_24] : memref<64x64xf32, #tpu.memory_space<vmem>>, vector<8x32xf32>
    tpu.vector_store %arg4[%c16_23, %c0_24], %77 {strides = array<i32>} : memref<64x64xf32, #tpu.memory_space<vmem>>, vector<8x32xf32>,
    %79 = vector.extract_strided_slice %76 {offsets = [0, 32], sizes = [8, 32], strides = [1, 1]} : vector<8x64xf32> to vector<8x32xf32>
    %c40 = arith.constant 40 : index
    %c32_25 = arith.constant 32 : index
    %80 = vector.load %arg4[%c40, %c32_25] : memref<64x64xf32, #tpu.memory_space<vmem>>, vector<8x32xf32>
    tpu.vector_store %arg4[%c40, %c32_25], %79 {strides = array<i32>} : memref<64x64xf32, #tpu.memory_space<vmem>>, vector<8x32xf32>,
    %81 = vector.extract_strided_slice %9 {offsets = [24, 0], sizes = [8, 256], strides = [1, 1]} : vector<64x256xf32> to vector<8x256xf32>
    %cst_26 = arith.constant dense<0.000000e+00> : vector<8x256xf32>
    %82 = tpu.matmul %76, %2, %cst_26 {dimension_numbers = #tpu.dot_dimension_numbers<[1], [0], [0], [1], [0, 0, 1, 1], [], []>} : vector<8x64xf32>, vector<64x256xf32>, vector<8x256xf32> -> vector<8x256xf32>
    %83 = arith.addf %81, %82 : vector<8x256xf32>
    %84 = vector.extract_strided_slice %83 {offsets = [0, 0], sizes = [8, 192], strides = [1, 1]} : vector<8x256xf32> to vector<8x192xf32>
    %85 = arith.negf %84 : vector<8x192xf32>
    %86 = math.exp %85 : vector<8x192xf32>
    %cst_27 = arith.constant 1.000000e+00 : f32
    %87 = vector.broadcast %cst_27 : f32 to vector<8x192xf32>
    %88 = arith.addf %87, %86 : vector<8x192xf32>
    %89 = arith.divf %87, %88 : vector<8x192xf32>
    %90 = vector.extract_strided_slice %83 {offsets = [0, 192], sizes = [8, 64], strides = [1, 1]} : vector<8x256xf32> to vector<8x64xf32>
    %91 = math.tanh %90 : vector<8x64xf32>
    %92 = vector.extract_strided_slice %89 {offsets = [0, 0], sizes = [8, 64], strides = [1, 1]} : vector<8x192xf32> to vector<8x64xf32>
    %93 = vector.extract_strided_slice %89 {offsets = [0, 64], sizes = [8, 64], strides = [1, 1]} : vector<8x192xf32> to vector<8x64xf32>
    %94 = vector.extract_strided_slice %89 {offsets = [0, 128], sizes = [8, 64], strides = [1, 1]} : vector<8x192xf32> to vector<8x64xf32>
    %95 = arith.mulf %93, %74 : vector<8x64xf32>
    %96 = arith.mulf %92, %91 : vector<8x64xf32>
    %97 = arith.addf %95, %96 : vector<8x64xf32>
    %98 = math.tanh %97 : vector<8x64xf32>
    %99 = arith.mulf %94, %98 : vector<8x64xf32>
    %100 = vector.extract_strided_slice %99 {offsets = [0, 0], sizes = [8, 32], strides = [1, 1]} : vector<8x64xf32> to vector<8x32xf32>
    %c24 = arith.constant 24 : index
    %c0_28 = arith.constant 0 : index
    %101 = vector.load %arg4[%c24, %c0_28] : memref<64x64xf32, #tpu.memory_space<vmem>>, vector<8x32xf32>
    tpu.vector_store %arg4[%c24, %c0_28], %100 {strides = array<i32>} : memref<64x64xf32, #tpu.memory_space<vmem>>, vector<8x32xf32>,
    %102 = vector.extract_strided_slice %99 {offsets = [0, 32], sizes = [8, 32], strides = [1, 1]} : vector<8x64xf32> to vector<8x32xf32>
    %c32_29 = arith.constant 32 : index
    %c32_30 = arith.constant 32 : index
    %103 = vector.load %arg4[%c32_29, %c32_30] : memref<64x64xf32, #tpu.memory_space<vmem>>, vector<8x32xf32>
    tpu.vector_store %arg4[%c32_29, %c32_30], %102 {strides = array<i32>} : memref<64x64xf32, #tpu.memory_space<vmem>>, vector<8x32xf32>,
    %104 = vector.extract_strided_slice %9 {offsets = [32, 0], sizes = [8, 256], strides = [1, 1]} : vector<64x256xf32> to vector<8x256xf32>
    %cst_31 = arith.constant dense<0.000000e+00> : vector<8x256xf32>
    %105 = tpu.matmul %99, %2, %cst_31 {dimension_numbers = #tpu.dot_dimension_numbers<[1], [0], [0], [1], [0, 0, 1, 1], [], []>} : vector<8x64xf32>, vector<64x256xf32>, vector<8x256xf32> -> vector<8x256xf32>
    %106 = arith.addf %104, %105 : vector<8x256xf32>
    %107 = vector.extract_strided_slice %106 {offsets = [0, 0], sizes = [8, 192], strides = [1, 1]} : vector<8x256xf32> to vector<8x192xf32>
    %108 = arith.negf %107 : vector<8x192xf32>
    %109 = math.exp %108 : vector<8x192xf32>
    %cst_32 = arith.constant 1.000000e+00 : f32
    %110 = vector.broadcast %cst_32 : f32 to vector<8x192xf32>
    %111 = arith.addf %110, %109 : vector<8x192xf32>
    %112 = arith.divf %110, %111 : vector<8x192xf32>
    %113 = vector.extract_strided_slice %106 {offsets = [0, 192], sizes = [8, 64], strides = [1, 1]} : vector<8x256xf32> to vector<8x64xf32>
    %114 = math.tanh %113 : vector<8x64xf32>
    %115 = vector.extract_strided_slice %112 {offsets = [0, 0], sizes = [8, 64], strides = [1, 1]} : vector<8x192xf32> to vector<8x64xf32>
    %116 = vector.extract_strided_slice %112 {offsets = [0, 64], sizes = [8, 64], strides = [1, 1]} : vector<8x192xf32> to vector<8x64xf32>
    %117 = vector.extract_strided_slice %112 {offsets = [0, 128], sizes = [8, 64], strides = [1, 1]} : vector<8x192xf32> to vector<8x64xf32>
    %118 = arith.mulf %116, %97 : vector<8x64xf32>
    %119 = arith.mulf %115, %114 : vector<8x64xf32>
    %120 = arith.addf %118, %119 : vector<8x64xf32>
    %121 = math.tanh %120 : vector<8x64xf32>
    %122 = arith.mulf %117, %121 : vector<8x64xf32>
    %123 = vector.extract_strided_slice %122 {offsets = [0, 0], sizes = [8, 32], strides = [1, 1]} : vector<8x64xf32> to vector<8x32xf32>
    %c32_33 = arith.constant 32 : index
    %c0_34 = arith.constant 0 : index
    %124 = vector.load %arg4[%c32_33, %c0_34] : memref<64x64xf32, #tpu.memory_space<vmem>>, vector<8x32xf32>
    tpu.vector_store %arg4[%c32_33, %c0_34], %123 {strides = array<i32>} : memref<64x64xf32, #tpu.memory_space<vmem>>, vector<8x32xf32>,
    %125 = vector.extract_strided_slice %122 {offsets = [0, 32], sizes = [8, 32], strides = [1, 1]} : vector<8x64xf32> to vector<8x32xf32>
    %c24_35 = arith.constant 24 : index
    %c32_36 = arith.constant 32 : index
    %126 = vector.load %arg4[%c24_35, %c32_36] : memref<64x64xf32, #tpu.memory_space<vmem>>, vector<8x32xf32>
    tpu.vector_store %arg4[%c24_35, %c32_36], %125 {strides = array<i32>} : memref<64x64xf32, #tpu.memory_space<vmem>>, vector<8x32xf32>,
    %127 = vector.extract_strided_slice %9 {offsets = [40, 0], sizes = [8, 256], strides = [1, 1]} : vector<64x256xf32> to vector<8x256xf32>
    %cst_37 = arith.constant dense<0.000000e+00> : vector<8x256xf32>
    %128 = tpu.matmul %122, %2, %cst_37 {dimension_numbers = #tpu.dot_dimension_numbers<[1], [0], [0], [1], [0, 0, 1, 1], [], []>} : vector<8x64xf32>, vector<64x256xf32>, vector<8x256xf32> -> vector<8x256xf32>
    %129 = arith.addf %127, %128 : vector<8x256xf32>
    %130 = vector.extract_strided_slice %129 {offsets = [0, 0], sizes = [8, 192], strides = [1, 1]} : vector<8x256xf32> to vector<8x192xf32>
    %131 = arith.negf %130 : vector<8x192xf32>
    %132 = math.exp %131 : vector<8x192xf32>
    %cst_38 = arith.constant 1.000000e+00 : f32
    %133 = vector.broadcast %cst_38 : f32 to vector<8x192xf32>
    %134 = arith.addf %133, %132 : vector<8x192xf32>
    %135 = arith.divf %133, %134 : vector<8x192xf32>
    %136 = vector.extract_strided_slice %129 {offsets = [0, 192], sizes = [8, 64], strides = [1, 1]} : vector<8x256xf32> to vector<8x64xf32>
    %137 = math.tanh %136 : vector<8x64xf32>
    %138 = vector.extract_strided_slice %135 {offsets = [0, 0], sizes = [8, 64], strides = [1, 1]} : vector<8x192xf32> to vector<8x64xf32>
    %139 = vector.extract_strided_slice %135 {offsets = [0, 64], sizes = [8, 64], strides = [1, 1]} : vector<8x192xf32> to vector<8x64xf32>
    %140 = vector.extract_strided_slice %135 {offsets = [0, 128], sizes = [8, 64], strides = [1, 1]} : vector<8x192xf32> to vector<8x64xf32>
    %141 = arith.mulf %139, %120 : vector<8x64xf32>
    %142 = arith.mulf %138, %137 : vector<8x64xf32>
    %143 = arith.addf %141, %142 : vector<8x64xf32>
    %144 = math.tanh %143 : vector<8x64xf32>
    %145 = arith.mulf %140, %144 : vector<8x64xf32>
    %146 = vector.extract_strided_slice %145 {offsets = [0, 0], sizes = [8, 32], strides = [1, 1]} : vector<8x64xf32> to vector<8x32xf32>
    %c40_39 = arith.constant 40 : index
    %c0_40 = arith.constant 0 : index
    %147 = vector.load %arg4[%c40_39, %c0_40] : memref<64x64xf32, #tpu.memory_space<vmem>>, vector<8x32xf32>
    tpu.vector_store %arg4[%c40_39, %c0_40], %146 {strides = array<i32>} : memref<64x64xf32, #tpu.memory_space<vmem>>, vector<8x32xf32>,
    %148 = vector.extract_strided_slice %145 {offsets = [0, 32], sizes = [8, 32], strides = [1, 1]} : vector<8x64xf32> to vector<8x32xf32>
    %c16_41 = arith.constant 16 : index
    %c32_42 = arith.constant 32 : index
    %149 = vector.load %arg4[%c16_41, %c32_42] : memref<64x64xf32, #tpu.memory_space<vmem>>, vector<8x32xf32>
    tpu.vector_store %arg4[%c16_41, %c32_42], %148 {strides = array<i32>} : memref<64x64xf32, #tpu.memory_space<vmem>>, vector<8x32xf32>,
    %150 = vector.extract_strided_slice %9 {offsets = [48, 0], sizes = [8, 256], strides = [1, 1]} : vector<64x256xf32> to vector<8x256xf32>
    %cst_43 = arith.constant dense<0.000000e+00> : vector<8x256xf32>
    %151 = tpu.matmul %145, %2, %cst_43 {dimension_numbers = #tpu.dot_dimension_numbers<[1], [0], [0], [1], [0, 0, 1, 1], [], []>} : vector<8x64xf32>, vector<64x256xf32>, vector<8x256xf32> -> vector<8x256xf32>
    %152 = arith.addf %150, %151 : vector<8x256xf32>
    %153 = vector.extract_strided_slice %152 {offsets = [0, 0], sizes = [8, 192], strides = [1, 1]} : vector<8x256xf32> to vector<8x192xf32>
    %154 = arith.negf %153 : vector<8x192xf32>
    %155 = math.exp %154 : vector<8x192xf32>
    %cst_44 = arith.constant 1.000000e+00 : f32
    %156 = vector.broadcast %cst_44 : f32 to vector<8x192xf32>
    %157 = arith.addf %156, %155 : vector<8x192xf32>
    %158 = arith.divf %156, %157 : vector<8x192xf32>
    %159 = vector.extract_strided_slice %152 {offsets = [0, 192], sizes = [8, 64], strides = [1, 1]} : vector<8x256xf32> to vector<8x64xf32>
    %160 = math.tanh %159 : vector<8x64xf32>
    %161 = vector.extract_strided_slice %158 {offsets = [0, 0], sizes = [8, 64], strides = [1, 1]} : vector<8x192xf32> to vector<8x64xf32>
    %162 = vector.extract_strided_slice %158 {offsets = [0, 64], sizes = [8, 64], strides = [1, 1]} : vector<8x192xf32> to vector<8x64xf32>
    %163 = vector.extract_strided_slice %158 {offsets = [0, 128], sizes = [8, 64], strides = [1, 1]} : vector<8x192xf32> to vector<8x64xf32>
    %164 = arith.mulf %162, %143 : vector<8x64xf32>
    %165 = arith.mulf %161, %160 : vector<8x64xf32>
    %166 = arith.addf %164, %165 : vector<8x64xf32>
    %167 = math.tanh %166 : vector<8x64xf32>
    %168 = arith.mulf %163, %167 : vector<8x64xf32>
    %169 = vector.extract_strided_slice %168 {offsets = [0, 0], sizes = [8, 32], strides = [1, 1]} : vector<8x64xf32> to vector<8x32xf32>
    %c48_45 = arith.constant 48 : index
    %c0_46 = arith.constant 0 : index
    %170 = vector.load %arg4[%c48_45, %c0_46] : memref<64x64xf32, #tpu.memory_space<vmem>>, vector<8x32xf32>
    tpu.vector_store %arg4[%c48_45, %c0_46], %169 {strides = array<i32>} : memref<64x64xf32, #tpu.memory_space<vmem>>, vector<8x32xf32>,
    %171 = vector.extract_strided_slice %168 {offsets = [0, 32], sizes = [8, 32], strides = [1, 1]} : vector<8x64xf32> to vector<8x32xf32>
    %c8_47 = arith.constant 8 : index
    %c32_48 = arith.constant 32 : index
    %172 = vector.load %arg4[%c8_47, %c32_48] : memref<64x64xf32, #tpu.memory_space<vmem>>, vector<8x32xf32>
    tpu.vector_store %arg4[%c8_47, %c32_48], %171 {strides = array<i32>} : memref<64x64xf32, #tpu.memory_space<vmem>>, vector<8x32xf32>,
    %173 = vector.extract_strided_slice %9 {offsets = [56, 0], sizes = [8, 256], strides = [1, 1]} : vector<64x256xf32> to vector<8x256xf32>
    %cst_49 = arith.constant dense<0.000000e+00> : vector<8x256xf32>
    %174 = tpu.matmul %168, %2, %cst_49 {dimension_numbers = #tpu.dot_dimension_numbers<[1], [0], [0], [1], [0, 0, 1, 1], [], []>} : vector<8x64xf32>, vector<64x256xf32>, vector<8x256xf32> -> vector<8x256xf32>
    %175 = arith.addf %173, %174 : vector<8x256xf32>
    %176 = vector.extract_strided_slice %175 {offsets = [0, 0], sizes = [8, 192], strides = [1, 1]} : vector<8x256xf32> to vector<8x192xf32>
    %177 = arith.negf %176 : vector<8x192xf32>
    %178 = math.exp %177 : vector<8x192xf32>
    %cst_50 = arith.constant 1.000000e+00 : f32
    %179 = vector.broadcast %cst_50 : f32 to vector<8x192xf32>
    %180 = arith.addf %179, %178 : vector<8x192xf32>
    %181 = arith.divf %179, %180 : vector<8x192xf32>
    %182 = vector.extract_strided_slice %175 {offsets = [0, 192], sizes = [8, 64], strides = [1, 1]} : vector<8x256xf32> to vector<8x64xf32>
    %183 = math.tanh %182 : vector<8x64xf32>
    %184 = vector.extract_strided_slice %181 {offsets = [0, 0], sizes = [8, 64], strides = [1, 1]} : vector<8x192xf32> to vector<8x64xf32>
    %185 = vector.extract_strided_slice %181 {offsets = [0, 64], sizes = [8, 64], strides = [1, 1]} : vector<8x192xf32> to vector<8x64xf32>
    %186 = vector.extract_strided_slice %181 {offsets = [0, 128], sizes = [8, 64], strides = [1, 1]} : vector<8x192xf32> to vector<8x64xf32>
    %187 = arith.mulf %185, %166 : vector<8x64xf32>
    %188 = arith.mulf %184, %183 : vector<8x64xf32>
    %189 = arith.addf %187, %188 : vector<8x64xf32>
    %190 = math.tanh %189 : vector<8x64xf32>
    %191 = arith.mulf %186, %190 : vector<8x64xf32>
    %192 = vector.extract_strided_slice %191 {offsets = [0, 0], sizes = [8, 32], strides = [1, 1]} : vector<8x64xf32> to vector<8x32xf32>
    %c56_51 = arith.constant 56 : index
    %c0_52 = arith.constant 0 : index
    %193 = vector.load %arg4[%c56_51, %c0_52] : memref<64x64xf32, #tpu.memory_space<vmem>>, vector<8x32xf32>
    tpu.vector_store %arg4[%c56_51, %c0_52], %192 {strides = array<i32>} : memref<64x64xf32, #tpu.memory_space<vmem>>, vector<8x32xf32>,
    %194 = vector.extract_strided_slice %191 {offsets = [0, 32], sizes = [8, 32], strides = [1, 1]} : vector<8x64xf32> to vector<8x32xf32>
    %c0_53 = arith.constant 0 : index
    %c32_54 = arith.constant 32 : index
    %195 = vector.load %arg4[%c0_53, %c32_54] : memref<64x64xf32, #tpu.memory_space<vmem>>, vector<8x32xf32>
    tpu.vector_store %arg4[%c0_53, %c32_54], %194 {strides = array<i32>} : memref<64x64xf32, #tpu.memory_space<vmem>>, vector<8x32xf32>,
    %c0_55 = arith.constant 0 : index
    %c0_56 = arith.constant 0 : index
    %196 = vector.load %arg4[%c0_55, %c0_56] : memref<64x64xf32, #tpu.memory_space<vmem>>, vector<64x64xf32>
    %cst_57 = arith.constant dense<0.000000e+00> : vector<64x128xf32>
    %197 = tpu.matmul %196, %3, %cst_57 {dimension_numbers = #tpu.dot_dimension_numbers<[1], [0], [0], [1], [0, 0, 1, 1], [], []>} : vector<64x64xf32>, vector<64x128xf32>, vector<64x128xf32> -> vector<64x128xf32>
    %198 = vector.broadcast %6 : vector<1x128xf32> to vector<64x128xf32>
    %199 = arith.addf %197, %198 : vector<64x128xf32>
    %cst_58 = arith.constant 0.000000e+00 : f32
    %200 = vector.broadcast %cst_58 : f32 to vector<8x32xf32>
    %cst_59 = arith.constant 0.000000e+00 : f32
    %201 = vector.broadcast %cst_59 : f32 to vector<8x32xf32>
    %202 = vector.extract_strided_slice %199 {offsets = [0, 0], sizes = [8, 128], strides = [1, 1]} : vector<64x128xf32> to vector<8x128xf32>
    %cst_60 = arith.constant dense<0.000000e+00> : vector<8x128xf32>
    %203 = tpu.matmul %200, %4, %cst_60 {dimension_numbers = #tpu.dot_dimension_numbers<[1], [0], [0], [1], [0, 0, 1, 1], [], []>} : vector<8x32xf32>, vector<32x128xf32>, vector<8x128xf32> -> vector<8x128xf32>
    %204 = arith.addf %202, %203 : vector<8x128xf32>
    %205 = vector.extract_strided_slice %204 {offsets = [0, 0], sizes = [8, 96], strides = [1, 1]} : vector<8x128xf32> to vector<8x96xf32>
    %206 = arith.negf %205 : vector<8x96xf32>
    %207 = math.exp %206 : vector<8x96xf32>
    %cst_61 = arith.constant 1.000000e+00 : f32
    %208 = vector.broadcast %cst_61 : f32 to vector<8x96xf32>
    %209 = arith.addf %208, %207 : vector<8x96xf32>
    %210 = arith.divf %208, %209 : vector<8x96xf32>
    %211 = vector.extract_strided_slice %204 {offsets = [0, 96], sizes = [8, 32], strides = [1, 1]} : vector<8x128xf32> to vector<8x32xf32>
    %212 = math.tanh %211 : vector<8x32xf32>
    %213 = vector.extract_strided_slice %210 {offsets = [0, 32], sizes = [8, 32], strides = [1, 1]} : vector<8x96xf32> to vector<8x32xf32>
    %214 = arith.mulf %213, %201 : vector<8x32xf32>
    %215 = vector.extract_strided_slice %210 {offsets = [0, 0], sizes = [8, 32], strides = [1, 1]} : vector<8x96xf32> to vector<8x32xf32>
    %216 = arith.mulf %215, %212 : vector<8x32xf32>
    %217 = arith.addf %214, %216 : vector<8x32xf32>
    %218 = vector.extract_strided_slice %210 {offsets = [0, 64], sizes = [8, 32], strides = [1, 1]} : vector<8x96xf32> to vector<8x32xf32>
    %219 = math.tanh %217 : vector<8x32xf32>
    %220 = arith.mulf %218, %219 : vector<8x32xf32>
    %c0_62 = arith.constant 0 : index
    %c0_63 = arith.constant 0 : index
    %221 = vector.load %arg5[%c0_62, %c0_63] : memref<64x32xf32, #tpu.memory_space<vmem>>, vector<8x32xf32>
    tpu.vector_store %arg5[%c0_62, %c0_63], %220 {strides = array<i32>} : memref<64x32xf32, #tpu.memory_space<vmem>>, vector<8x32xf32>,
    %222 = vector.extract_strided_slice %199 {offsets = [8, 0], sizes = [8, 128], strides = [1, 1]} : vector<64x128xf32> to vector<8x128xf32>
    %cst_64 = arith.constant dense<0.000000e+00> : vector<8x128xf32>
    %223 = tpu.matmul %220, %4, %cst_64 {dimension_numbers = #tpu.dot_dimension_numbers<[1], [0], [0], [1], [0, 0, 1, 1], [], []>} : vector<8x32xf32>, vector<32x128xf32>, vector<8x128xf32> -> vector<8x128xf32>
    %224 = arith.addf %222, %223 : vector<8x128xf32>
    %225 = vector.extract_strided_slice %224 {offsets = [0, 0], sizes = [8, 96], strides = [1, 1]} : vector<8x128xf32> to vector<8x96xf32>
    %226 = arith.negf %225 : vector<8x96xf32>
    %227 = math.exp %226 : vector<8x96xf32>
    %cst_65 = arith.constant 1.000000e+00 : f32
    %228 = vector.broadcast %cst_65 : f32 to vector<8x96xf32>
    %229 = arith.addf %228, %227 : vector<8x96xf32>
    %230 = arith.divf %228, %229 : vector<8x96xf32>
    %231 = vector.extract_strided_slice %224 {offsets = [0, 96], sizes = [8, 32], strides = [1, 1]} : vector<8x128xf32> to vector<8x32xf32>
    %232 = math.tanh %231 : vector<8x32xf32>
    %233 = vector.extract_strided_slice %230 {offsets = [0, 32], sizes = [8, 32], strides = [1, 1]} : vector<8x96xf32> to vector<8x32xf32>
    %234 = arith.mulf %233, %217 : vector<8x32xf32>
    %235 = vector.extract_strided_slice %230 {offsets = [0, 0], sizes = [8, 32], strides = [1, 1]} : vector<8x96xf32> to vector<8x32xf32>
    %236 = arith.mulf %235, %232 : vector<8x32xf32>
    %237 = arith.addf %234, %236 : vector<8x32xf32>
    %238 = vector.extract_strided_slice %230 {offsets = [0, 64], sizes = [8, 32], strides = [1, 1]} : vector<8x96xf32> to vector<8x32xf32>
    %239 = math.tanh %237 : vector<8x32xf32>
    %240 = arith.mulf %238, %239 : vector<8x32xf32>
    %c8_66 = arith.constant 8 : index
    %c0_67 = arith.constant 0 : index
    %241 = vector.load %arg5[%c8_66, %c0_67] : memref<64x32xf32, #tpu.memory_space<vmem>>, vector<8x32xf32>
    tpu.vector_store %arg5[%c8_66, %c0_67], %240 {strides = array<i32>} : memref<64x32xf32, #tpu.memory_space<vmem>>, vector<8x32xf32>,
    %242 = vector.extract_strided_slice %199 {offsets = [16, 0], sizes = [8, 128], strides = [1, 1]} : vector<64x128xf32> to vector<8x128xf32>
    %cst_68 = arith.constant dense<0.000000e+00> : vector<8x128xf32>
    %243 = tpu.matmul %240, %4, %cst_68 {dimension_numbers = #tpu.dot_dimension_numbers<[1], [0], [0], [1], [0, 0, 1, 1], [], []>} : vector<8x32xf32>, vector<32x128xf32>, vector<8x128xf32> -> vector<8x128xf32>
    %244 = arith.addf %242, %243 : vector<8x128xf32>
    %245 = vector.extract_strided_slice %244 {offsets = [0, 0], sizes = [8, 96], strides = [1, 1]} : vector<8x128xf32> to vector<8x96xf32>
    %246 = arith.negf %245 : vector<8x96xf32>
    %247 = math.exp %246 : vector<8x96xf32>
    %cst_69 = arith.constant 1.000000e+00 : f32
    %248 = vector.broadcast %cst_69 : f32 to vector<8x96xf32>
    %249 = arith.addf %248, %247 : vector<8x96xf32>
    %250 = arith.divf %248, %249 : vector<8x96xf32>
    %251 = vector.extract_strided_slice %244 {offsets = [0, 96], sizes = [8, 32], strides = [1, 1]} : vector<8x128xf32> to vector<8x32xf32>
    %252 = math.tanh %251 : vector<8x32xf32>
    %253 = vector.extract_strided_slice %250 {offsets = [0, 32], sizes = [8, 32], strides = [1, 1]} : vector<8x96xf32> to vector<8x32xf32>
    %254 = arith.mulf %253, %237 : vector<8x32xf32>
    %255 = vector.extract_strided_slice %250 {offsets = [0, 0], sizes = [8, 32], strides = [1, 1]} : vector<8x96xf32> to vector<8x32xf32>
    %256 = arith.mulf %255, %252 : vector<8x32xf32>
    %257 = arith.addf %254, %256 : vector<8x32xf32>
    %258 = vector.extract_strided_slice %250 {offsets = [0, 64], sizes = [8, 32], strides = [1, 1]} : vector<8x96xf32> to vector<8x32xf32>
    %259 = math.tanh %257 : vector<8x32xf32>
    %260 = arith.mulf %258, %259 : vector<8x32xf32>
    %c16_70 = arith.constant 16 : index
    %c0_71 = arith.constant 0 : index
    %261 = vector.load %arg5[%c16_70, %c0_71] : memref<64x32xf32, #tpu.memory_space<vmem>>, vector<8x32xf32>
    tpu.vector_store %arg5[%c16_70, %c0_71], %260 {strides = array<i32>} : memref<64x32xf32, #tpu.memory_space<vmem>>, vector<8x32xf32>,
    %262 = vector.extract_strided_slice %199 {offsets = [24, 0], sizes = [8, 128], strides = [1, 1]} : vector<64x128xf32> to vector<8x128xf32>
    %cst_72 = arith.constant dense<0.000000e+00> : vector<8x128xf32>
    %263 = tpu.matmul %260, %4, %cst_72 {dimension_numbers = #tpu.dot_dimension_numbers<[1], [0], [0], [1], [0, 0, 1, 1], [], []>} : vector<8x32xf32>, vector<32x128xf32>, vector<8x128xf32> -> vector<8x128xf32>
    %264 = arith.addf %262, %263 : vector<8x128xf32>
    %265 = vector.extract_strided_slice %264 {offsets = [0, 0], sizes = [8, 96], strides = [1, 1]} : vector<8x128xf32> to vector<8x96xf32>
    %266 = arith.negf %265 : vector<8x96xf32>
    %267 = math.exp %266 : vector<8x96xf32>
    %cst_73 = arith.constant 1.000000e+00 : f32
    %268 = vector.broadcast %cst_73 : f32 to vector<8x96xf32>
    %269 = arith.addf %268, %267 : vector<8x96xf32>
    %270 = arith.divf %268, %269 : vector<8x96xf32>
    %271 = vector.extract_strided_slice %264 {offsets = [0, 96], sizes = [8, 32], strides = [1, 1]} : vector<8x128xf32> to vector<8x32xf32>
    %272 = math.tanh %271 : vector<8x32xf32>
    %273 = vector.extract_strided_slice %270 {offsets = [0, 32], sizes = [8, 32], strides = [1, 1]} : vector<8x96xf32> to vector<8x32xf32>
    %274 = arith.mulf %273, %257 : vector<8x32xf32>
    %275 = vector.extract_strided_slice %270 {offsets = [0, 0], sizes = [8, 32], strides = [1, 1]} : vector<8x96xf32> to vector<8x32xf32>
    %276 = arith.mulf %275, %272 : vector<8x32xf32>
    %277 = arith.addf %274, %276 : vector<8x32xf32>
    %278 = vector.extract_strided_slice %270 {offsets = [0, 64], sizes = [8, 32], strides = [1, 1]} : vector<8x96xf32> to vector<8x32xf32>
    %279 = math.tanh %277 : vector<8x32xf32>
    %280 = arith.mulf %278, %279 : vector<8x32xf32>
    %c24_74 = arith.constant 24 : index
    %c0_75 = arith.constant 0 : index
    %281 = vector.load %arg5[%c24_74, %c0_75] : memref<64x32xf32, #tpu.memory_space<vmem>>, vector<8x32xf32>
    tpu.vector_store %arg5[%c24_74, %c0_75], %280 {strides = array<i32>} : memref<64x32xf32, #tpu.memory_space<vmem>>, vector<8x32xf32>,
    %282 = vector.extract_strided_slice %199 {offsets = [32, 0], sizes = [8, 128], strides = [1, 1]} : vector<64x128xf32> to vector<8x128xf32>
    %cst_76 = arith.constant dense<0.000000e+00> : vector<8x128xf32>
    %283 = tpu.matmul %280, %4, %cst_76 {dimension_numbers = #tpu.dot_dimension_numbers<[1], [0], [0], [1], [0, 0, 1, 1], [], []>} : vector<8x32xf32>, vector<32x128xf32>, vector<8x128xf32> -> vector<8x128xf32>
    %284 = arith.addf %282, %283 : vector<8x128xf32>
    %285 = vector.extract_strided_slice %284 {offsets = [0, 0], sizes = [8, 96], strides = [1, 1]} : vector<8x128xf32> to vector<8x96xf32>
    %286 = arith.negf %285 : vector<8x96xf32>
    %287 = math.exp %286 : vector<8x96xf32>
    %cst_77 = arith.constant 1.000000e+00 : f32
    %288 = vector.broadcast %cst_77 : f32 to vector<8x96xf32>
    %289 = arith.addf %288, %287 : vector<8x96xf32>
    %290 = arith.divf %288, %289 : vector<8x96xf32>
    %291 = vector.extract_strided_slice %284 {offsets = [0, 96], sizes = [8, 32], strides = [1, 1]} : vector<8x128xf32> to vector<8x32xf32>
    %292 = math.tanh %291 : vector<8x32xf32>
    %293 = vector.extract_strided_slice %290 {offsets = [0, 32], sizes = [8, 32], strides = [1, 1]} : vector<8x96xf32> to vector<8x32xf32>
    %294 = arith.mulf %293, %277 : vector<8x32xf32>
    %295 = vector.extract_strided_slice %290 {offsets = [0, 0], sizes = [8, 32], strides = [1, 1]} : vector<8x96xf32> to vector<8x32xf32>
    %296 = arith.mulf %295, %292 : vector<8x32xf32>
    %297 = arith.addf %294, %296 : vector<8x32xf32>
    %298 = vector.extract_strided_slice %290 {offsets = [0, 64], sizes = [8, 32], strides = [1, 1]} : vector<8x96xf32> to vector<8x32xf32>
    %299 = math.tanh %297 : vector<8x32xf32>
    %300 = arith.mulf %298, %299 : vector<8x32xf32>
    %c32_78 = arith.constant 32 : index
    %c0_79 = arith.constant 0 : index
    %301 = vector.load %arg5[%c32_78, %c0_79] : memref<64x32xf32, #tpu.memory_space<vmem>>, vector<8x32xf32>
    tpu.vector_store %arg5[%c32_78, %c0_79], %300 {strides = array<i32>} : memref<64x32xf32, #tpu.memory_space<vmem>>, vector<8x32xf32>,
    %302 = vector.extract_strided_slice %199 {offsets = [40, 0], sizes = [8, 128], strides = [1, 1]} : vector<64x128xf32> to vector<8x128xf32>
    %cst_80 = arith.constant dense<0.000000e+00> : vector<8x128xf32>
    %303 = tpu.matmul %300, %4, %cst_80 {dimension_numbers = #tpu.dot_dimension_numbers<[1], [0], [0], [1], [0, 0, 1, 1], [], []>} : vector<8x32xf32>, vector<32x128xf32>, vector<8x128xf32> -> vector<8x128xf32>
    %304 = arith.addf %302, %303 : vector<8x128xf32>
    %305 = vector.extract_strided_slice %304 {offsets = [0, 0], sizes = [8, 96], strides = [1, 1]} : vector<8x128xf32> to vector<8x96xf32>
    %306 = arith.negf %305 : vector<8x96xf32>
    %307 = math.exp %306 : vector<8x96xf32>
    %cst_81 = arith.constant 1.000000e+00 : f32
    %308 = vector.broadcast %cst_81 : f32 to vector<8x96xf32>
    %309 = arith.addf %308, %307 : vector<8x96xf32>
    %310 = arith.divf %308, %309 : vector<8x96xf32>
    %311 = vector.extract_strided_slice %304 {offsets = [0, 96], sizes = [8, 32], strides = [1, 1]} : vector<8x128xf32> to vector<8x32xf32>
    %312 = math.tanh %311 : vector<8x32xf32>
    %313 = vector.extract_strided_slice %310 {offsets = [0, 32], sizes = [8, 32], strides = [1, 1]} : vector<8x96xf32> to vector<8x32xf32>
    %314 = arith.mulf %313, %297 : vector<8x32xf32>
    %315 = vector.extract_strided_slice %310 {offsets = [0, 0], sizes = [8, 32], strides = [1, 1]} : vector<8x96xf32> to vector<8x32xf32>
    %316 = arith.mulf %315, %312 : vector<8x32xf32>
    %317 = arith.addf %314, %316 : vector<8x32xf32>
    %318 = vector.extract_strided_slice %310 {offsets = [0, 64], sizes = [8, 32], strides = [1, 1]} : vector<8x96xf32> to vector<8x32xf32>
    %319 = math.tanh %317 : vector<8x32xf32>
    %320 = arith.mulf %318, %319 : vector<8x32xf32>
    %c40_82 = arith.constant 40 : index
    %c0_83 = arith.constant 0 : index
    %321 = vector.load %arg5[%c40_82, %c0_83] : memref<64x32xf32, #tpu.memory_space<vmem>>, vector<8x32xf32>
    tpu.vector_store %arg5[%c40_82, %c0_83], %320 {strides = array<i32>} : memref<64x32xf32, #tpu.memory_space<vmem>>, vector<8x32xf32>,
    %322 = vector.extract_strided_slice %199 {offsets = [48, 0], sizes = [8, 128], strides = [1, 1]} : vector<64x128xf32> to vector<8x128xf32>
    %cst_84 = arith.constant dense<0.000000e+00> : vector<8x128xf32>
    %323 = tpu.matmul %320, %4, %cst_84 {dimension_numbers = #tpu.dot_dimension_numbers<[1], [0], [0], [1], [0, 0, 1, 1], [], []>} : vector<8x32xf32>, vector<32x128xf32>, vector<8x128xf32> -> vector<8x128xf32>
    %324 = arith.addf %322, %323 : vector<8x128xf32>
    %325 = vector.extract_strided_slice %324 {offsets = [0, 0], sizes = [8, 96], strides = [1, 1]} : vector<8x128xf32> to vector<8x96xf32>
    %326 = arith.negf %325 : vector<8x96xf32>
    %327 = math.exp %326 : vector<8x96xf32>
    %cst_85 = arith.constant 1.000000e+00 : f32
    %328 = vector.broadcast %cst_85 : f32 to vector<8x96xf32>
    %329 = arith.addf %328, %327 : vector<8x96xf32>
    %330 = arith.divf %328, %329 : vector<8x96xf32>
    %331 = vector.extract_strided_slice %324 {offsets = [0, 96], sizes = [8, 32], strides = [1, 1]} : vector<8x128xf32> to vector<8x32xf32>
    %332 = math.tanh %331 : vector<8x32xf32>
    %333 = vector.extract_strided_slice %330 {offsets = [0, 32], sizes = [8, 32], strides = [1, 1]} : vector<8x96xf32> to vector<8x32xf32>
    %334 = arith.mulf %333, %317 : vector<8x32xf32>
    %335 = vector.extract_strided_slice %330 {offsets = [0, 0], sizes = [8, 32], strides = [1, 1]} : vector<8x96xf32> to vector<8x32xf32>
    %336 = arith.mulf %335, %332 : vector<8x32xf32>
    %337 = arith.addf %334, %336 : vector<8x32xf32>
    %338 = vector.extract_strided_slice %330 {offsets = [0, 64], sizes = [8, 32], strides = [1, 1]} : vector<8x96xf32> to vector<8x32xf32>
    %339 = math.tanh %337 : vector<8x32xf32>
    %340 = arith.mulf %338, %339 : vector<8x32xf32>
    %c48_86 = arith.constant 48 : index
    %c0_87 = arith.constant 0 : index
    %341 = vector.load %arg5[%c48_86, %c0_87] : memref<64x32xf32, #tpu.memory_space<vmem>>, vector<8x32xf32>
    tpu.vector_store %arg5[%c48_86, %c0_87], %340 {strides = array<i32>} : memref<64x32xf32, #tpu.memory_space<vmem>>, vector<8x32xf32>,
    %342 = vector.extract_strided_slice %199 {offsets = [56, 0], sizes = [8, 128], strides = [1, 1]} : vector<64x128xf32> to vector<8x128xf32>
    %cst_88 = arith.constant dense<0.000000e+00> : vector<8x128xf32>
    %343 = tpu.matmul %340, %4, %cst_88 {dimension_numbers = #tpu.dot_dimension_numbers<[1], [0], [0], [1], [0, 0, 1, 1], [], []>} : vector<8x32xf32>, vector<32x128xf32>, vector<8x128xf32> -> vector<8x128xf32>
    %344 = arith.addf %342, %343 : vector<8x128xf32>
    %345 = vector.extract_strided_slice %344 {offsets = [0, 0], sizes = [8, 96], strides = [1, 1]} : vector<8x128xf32> to vector<8x96xf32>
    %346 = arith.negf %345 : vector<8x96xf32>
    %347 = math.exp %346 : vector<8x96xf32>
    %cst_89 = arith.constant 1.000000e+00 : f32
    %348 = vector.broadcast %cst_89 : f32 to vector<8x96xf32>
    %349 = arith.addf %348, %347 : vector<8x96xf32>
    %350 = arith.divf %348, %349 : vector<8x96xf32>
    %351 = vector.extract_strided_slice %344 {offsets = [0, 96], sizes = [8, 32], strides = [1, 1]} : vector<8x128xf32> to vector<8x32xf32>
    %352 = math.tanh %351 : vector<8x32xf32>
    %353 = vector.extract_strided_slice %350 {offsets = [0, 32], sizes = [8, 32], strides = [1, 1]} : vector<8x96xf32> to vector<8x32xf32>
    %354 = arith.mulf %353, %337 : vector<8x32xf32>
    %355 = vector.extract_strided_slice %350 {offsets = [0, 0], sizes = [8, 32], strides = [1, 1]} : vector<8x96xf32> to vector<8x32xf32>
    %356 = arith.mulf %355, %352 : vector<8x32xf32>
    %357 = arith.addf %354, %356 : vector<8x32xf32>
    %358 = vector.extract_strided_slice %350 {offsets = [0, 64], sizes = [8, 32], strides = [1, 1]} : vector<8x96xf32> to vector<8x32xf32>
    %359 = math.tanh %357 : vector<8x32xf32>
    %360 = arith.mulf %358, %359 : vector<8x32xf32>
    %c56_90 = arith.constant 56 : index
    %c0_91 = arith.constant 0 : index
    %361 = vector.load %arg5[%c56_90, %c0_91] : memref<64x32xf32, #tpu.memory_space<vmem>>, vector<8x32xf32>
    tpu.vector_store %arg5[%c56_90, %c0_91], %360 {strides = array<i32>} : memref<64x32xf32, #tpu.memory_space<vmem>>, vector<8x32xf32>,
    %c0_92 = arith.constant 0 : index
    %c0_93 = arith.constant 0 : index
    %362 = vector.load %arg5[%c0_92, %c0_93] : memref<64x32xf32, #tpu.memory_space<vmem>>, vector<64x32xf32>
    %cst_94 = arith.constant dense<0.000000e+00> : vector<64x128xf32>
    %363 = tpu.matmul %362, %5, %cst_94 {dimension_numbers = #tpu.dot_dimension_numbers<[1], [0], [0], [1], [0, 0, 1, 1], [], []>} : vector<64x32xf32>, vector<32x128xf32>, vector<64x128xf32> -> vector<64x128xf32>
    %364 = vector.broadcast %7 : vector<1x128xf32> to vector<64x128xf32>
    %365 = arith.addf %363, %364 : vector<64x128xf32>
    %366 = tpu.iota {dimensions = array<i32: 1>} : vector<8x128xi32>
    %cst_95 = arith.constant 0.000000e+00 : f32
    %367 = vector.broadcast %cst_95 : f32 to vector<8x128xf32>
    %cst_96 = arith.constant 0.000000e+00 : f32
    %368 = vector.broadcast %cst_96 : f32 to vector<8x32xf32>
    %cst_97 = arith.constant 0.000000e+00 : f32
    %369 = vector.broadcast %cst_97 : f32 to vector<8x32xf32>
    %370 = vector.extract_strided_slice %365 {offsets = [0, 0], sizes = [8, 128], strides = [1, 1]} : vector<64x128xf32> to vector<8x128xf32>
    %371 = vector.extract_strided_slice %368 {offsets = [0, 0], sizes = [8, 1], strides = [1, 1]} : vector<8x32xf32> to vector<8x1xf32>
    %372 = vector.broadcast %371 : vector<8x1xf32> to vector<8x128xf32>
    %373 = vector.broadcast %8 : vector<1x128xf32> to vector<8x128xf32>
    %374 = arith.mulf %372, %373 : vector<8x128xf32>
    %375 = arith.addf %370, %374 : vector<8x128xf32>
    %376 = vector.extract_strided_slice %375 {offsets = [0, 0], sizes = [8, 96], strides = [1, 1]} : vector<8x128xf32> to vector<8x96xf32>
    %377 = arith.negf %376 : vector<8x96xf32>
    %378 = math.exp %377 : vector<8x96xf32>
    %cst_98 = arith.constant 1.000000e+00 : f32
    %379 = vector.broadcast %cst_98 : f32 to vector<8x96xf32>
    %380 = arith.addf %379, %378 : vector<8x96xf32>
    %381 = arith.divf %379, %380 : vector<8x96xf32>
    %382 = vector.extract_strided_slice %375 {offsets = [0, 96], sizes = [8, 32], strides = [1, 1]} : vector<8x128xf32> to vector<8x32xf32>
    %383 = math.tanh %382 : vector<8x32xf32>
    %384 = vector.extract_strided_slice %381 {offsets = [0, 32], sizes = [8, 32], strides = [1, 1]} : vector<8x96xf32> to vector<8x32xf32>
    %385 = arith.mulf %384, %369 : vector<8x32xf32>
    %386 = vector.extract_strided_slice %381 {offsets = [0, 0], sizes = [8, 32], strides = [1, 1]} : vector<8x96xf32> to vector<8x32xf32>
    %387 = arith.mulf %386, %383 : vector<8x32xf32>
    %388 = arith.addf %385, %387 : vector<8x32xf32>
    %389 = vector.extract_strided_slice %381 {offsets = [0, 64], sizes = [8, 32], strides = [1, 1]} : vector<8x96xf32> to vector<8x32xf32>
    %390 = math.tanh %388 : vector<8x32xf32>
    %391 = arith.mulf %389, %390 : vector<8x32xf32>
    %392 = vector.extract_strided_slice %391 {offsets = [0, 0], sizes = [8, 1], strides = [1, 1]} : vector<8x32xf32> to vector<8x1xf32>
    %cst_99 = arith.constant 0.000000e+00 : f32
    %393 = vector.broadcast %cst_99 : f32 to vector<8x1xf32>
    %394 = arith.maximumf %392, %393 : vector<8x1xf32>
    %395 = vector.shape_cast %394 : vector<8x1xf32> to vector<8x1xf32>
    %396 = vector.broadcast %395 : vector<8x1xf32> to vector<8x128xf32>
    %c0_i32 = arith.constant 0 : i32
    %397 = vector.broadcast %c0_i32 : i32 to vector<8x128xi32>
    %398 = arith.cmpi eq, %366, %397 : vector<8x128xi32>
    %399 = arith.select %398, %396, %367 : vector<8x128xi1>, vector<8x128xf32>
    %400 = vector.extract_strided_slice %365 {offsets = [8, 0], sizes = [8, 128], strides = [1, 1]} : vector<64x128xf32> to vector<8x128xf32>
    %401 = vector.extract_strided_slice %391 {offsets = [0, 0], sizes = [8, 1], strides = [1, 1]} : vector<8x32xf32> to vector<8x1xf32>
    %402 = vector.broadcast %401 : vector<8x1xf32> to vector<8x128xf32>
    %403 = vector.broadcast %8 : vector<1x128xf32> to vector<8x128xf32>
    %404 = arith.mulf %402, %403 : vector<8x128xf32>
    %405 = arith.addf %400, %404 : vector<8x128xf32>
    %406 = vector.extract_strided_slice %405 {offsets = [0, 0], sizes = [8, 96], strides = [1, 1]} : vector<8x128xf32> to vector<8x96xf32>
    %407 = arith.negf %406 : vector<8x96xf32>
    %408 = math.exp %407 : vector<8x96xf32>
    %cst_100 = arith.constant 1.000000e+00 : f32
    %409 = vector.broadcast %cst_100 : f32 to vector<8x96xf32>
    %410 = arith.addf %409, %408 : vector<8x96xf32>
    %411 = arith.divf %409, %410 : vector<8x96xf32>
    %412 = vector.extract_strided_slice %405 {offsets = [0, 96], sizes = [8, 32], strides = [1, 1]} : vector<8x128xf32> to vector<8x32xf32>
    %413 = math.tanh %412 : vector<8x32xf32>
    %414 = vector.extract_strided_slice %411 {offsets = [0, 32], sizes = [8, 32], strides = [1, 1]} : vector<8x96xf32> to vector<8x32xf32>
    %415 = arith.mulf %414, %388 : vector<8x32xf32>
    %416 = vector.extract_strided_slice %411 {offsets = [0, 0], sizes = [8, 32], strides = [1, 1]} : vector<8x96xf32> to vector<8x32xf32>
    %417 = arith.mulf %416, %413 : vector<8x32xf32>
    %418 = arith.addf %415, %417 : vector<8x32xf32>
    %419 = vector.extract_strided_slice %411 {offsets = [0, 64], sizes = [8, 32], strides = [1, 1]} : vector<8x96xf32> to vector<8x32xf32>
    %420 = math.tanh %418 : vector<8x32xf32>
    %421 = arith.mulf %419, %420 : vector<8x32xf32>
    %422 = vector.extract_strided_slice %421 {offsets = [0, 0], sizes = [8, 1], strides = [1, 1]} : vector<8x32xf32> to vector<8x1xf32>
    %cst_101 = arith.constant 0.000000e+00 : f32
    %423 = vector.broadcast %cst_101 : f32 to vector<8x1xf32>
    %424 = arith.maximumf %422, %423 : vector<8x1xf32>
    %425 = vector.shape_cast %424 : vector<8x1xf32> to vector<8x1xf32>
    %426 = vector.broadcast %425 : vector<8x1xf32> to vector<8x128xf32>
    %c1_i32 = arith.constant 1 : i32
    %427 = vector.broadcast %c1_i32 : i32 to vector<8x128xi32>
    %428 = arith.cmpi eq, %366, %427 : vector<8x128xi32>
    %429 = arith.select %428, %426, %399 : vector<8x128xi1>, vector<8x128xf32>
    %430 = vector.extract_strided_slice %365 {offsets = [16, 0], sizes = [8, 128], strides = [1, 1]} : vector<64x128xf32> to vector<8x128xf32>
    %431 = vector.extract_strided_slice %421 {offsets = [0, 0], sizes = [8, 1], strides = [1, 1]} : vector<8x32xf32> to vector<8x1xf32>
    %432 = vector.broadcast %431 : vector<8x1xf32> to vector<8x128xf32>
    %433 = vector.broadcast %8 : vector<1x128xf32> to vector<8x128xf32>
    %434 = arith.mulf %432, %433 : vector<8x128xf32>
    %435 = arith.addf %430, %434 : vector<8x128xf32>
    %436 = vector.extract_strided_slice %435 {offsets = [0, 0], sizes = [8, 96], strides = [1, 1]} : vector<8x128xf32> to vector<8x96xf32>
    %437 = arith.negf %436 : vector<8x96xf32>
    %438 = math.exp %437 : vector<8x96xf32>
    %cst_102 = arith.constant 1.000000e+00 : f32
    %439 = vector.broadcast %cst_102 : f32 to vector<8x96xf32>
    %440 = arith.addf %439, %438 : vector<8x96xf32>
    %441 = arith.divf %439, %440 : vector<8x96xf32>
    %442 = vector.extract_strided_slice %435 {offsets = [0, 96], sizes = [8, 32], strides = [1, 1]} : vector<8x128xf32> to vector<8x32xf32>
    %443 = math.tanh %442 : vector<8x32xf32>
    %444 = vector.extract_strided_slice %441 {offsets = [0, 32], sizes = [8, 32], strides = [1, 1]} : vector<8x96xf32> to vector<8x32xf32>
    %445 = arith.mulf %444, %418 : vector<8x32xf32>
    %446 = vector.extract_strided_slice %441 {offsets = [0, 0], sizes = [8, 32], strides = [1, 1]} : vector<8x96xf32> to vector<8x32xf32>
    %447 = arith.mulf %446, %443 : vector<8x32xf32>
    %448 = arith.addf %445, %447 : vector<8x32xf32>
    %449 = vector.extract_strided_slice %441 {offsets = [0, 64], sizes = [8, 32], strides = [1, 1]} : vector<8x96xf32> to vector<8x32xf32>
    %450 = math.tanh %448 : vector<8x32xf32>
    %451 = arith.mulf %449, %450 : vector<8x32xf32>
    %452 = vector.extract_strided_slice %451 {offsets = [0, 0], sizes = [8, 1], strides = [1, 1]} : vector<8x32xf32> to vector<8x1xf32>
    %cst_103 = arith.constant 0.000000e+00 : f32
    %453 = vector.broadcast %cst_103 : f32 to vector<8x1xf32>
    %454 = arith.maximumf %452, %453 : vector<8x1xf32>
    %455 = vector.shape_cast %454 : vector<8x1xf32> to vector<8x1xf32>
    %456 = vector.broadcast %455 : vector<8x1xf32> to vector<8x128xf32>
    %c2_i32 = arith.constant 2 : i32
    %457 = vector.broadcast %c2_i32 : i32 to vector<8x128xi32>
    %458 = arith.cmpi eq, %366, %457 : vector<8x128xi32>
    %459 = arith.select %458, %456, %429 : vector<8x128xi1>, vector<8x128xf32>
    %460 = vector.extract_strided_slice %365 {offsets = [24, 0], sizes = [8, 128], strides = [1, 1]} : vector<64x128xf32> to vector<8x128xf32>
    %461 = vector.extract_strided_slice %451 {offsets = [0, 0], sizes = [8, 1], strides = [1, 1]} : vector<8x32xf32> to vector<8x1xf32>
    %462 = vector.broadcast %461 : vector<8x1xf32> to vector<8x128xf32>
    %463 = vector.broadcast %8 : vector<1x128xf32> to vector<8x128xf32>
    %464 = arith.mulf %462, %463 : vector<8x128xf32>
    %465 = arith.addf %460, %464 : vector<8x128xf32>
    %466 = vector.extract_strided_slice %465 {offsets = [0, 0], sizes = [8, 96], strides = [1, 1]} : vector<8x128xf32> to vector<8x96xf32>
    %467 = arith.negf %466 : vector<8x96xf32>
    %468 = math.exp %467 : vector<8x96xf32>
    %cst_104 = arith.constant 1.000000e+00 : f32
    %469 = vector.broadcast %cst_104 : f32 to vector<8x96xf32>
    %470 = arith.addf %469, %468 : vector<8x96xf32>
    %471 = arith.divf %469, %470 : vector<8x96xf32>
    %472 = vector.extract_strided_slice %465 {offsets = [0, 96], sizes = [8, 32], strides = [1, 1]} : vector<8x128xf32> to vector<8x32xf32>
    %473 = math.tanh %472 : vector<8x32xf32>
    %474 = vector.extract_strided_slice %471 {offsets = [0, 32], sizes = [8, 32], strides = [1, 1]} : vector<8x96xf32> to vector<8x32xf32>
    %475 = arith.mulf %474, %448 : vector<8x32xf32>
    %476 = vector.extract_strided_slice %471 {offsets = [0, 0], sizes = [8, 32], strides = [1, 1]} : vector<8x96xf32> to vector<8x32xf32>
    %477 = arith.mulf %476, %473 : vector<8x32xf32>
    %478 = arith.addf %475, %477 : vector<8x32xf32>
    %479 = vector.extract_strided_slice %471 {offsets = [0, 64], sizes = [8, 32], strides = [1, 1]} : vector<8x96xf32> to vector<8x32xf32>
    %480 = math.tanh %478 : vector<8x32xf32>
    %481 = arith.mulf %479, %480 : vector<8x32xf32>
    %482 = vector.extract_strided_slice %481 {offsets = [0, 0], sizes = [8, 1], strides = [1, 1]} : vector<8x32xf32> to vector<8x1xf32>
    %cst_105 = arith.constant 0.000000e+00 : f32
    %483 = vector.broadcast %cst_105 : f32 to vector<8x1xf32>
    %484 = arith.maximumf %482, %483 : vector<8x1xf32>
    %485 = vector.shape_cast %484 : vector<8x1xf32> to vector<8x1xf32>
    %486 = vector.broadcast %485 : vector<8x1xf32> to vector<8x128xf32>
    %c3_i32 = arith.constant 3 : i32
    %487 = vector.broadcast %c3_i32 : i32 to vector<8x128xi32>
    %488 = arith.cmpi eq, %366, %487 : vector<8x128xi32>
    %489 = arith.select %488, %486, %459 : vector<8x128xi1>, vector<8x128xf32>
    %490 = vector.extract_strided_slice %365 {offsets = [32, 0], sizes = [8, 128], strides = [1, 1]} : vector<64x128xf32> to vector<8x128xf32>
    %491 = vector.extract_strided_slice %481 {offsets = [0, 0], sizes = [8, 1], strides = [1, 1]} : vector<8x32xf32> to vector<8x1xf32>
    %492 = vector.broadcast %491 : vector<8x1xf32> to vector<8x128xf32>
    %493 = vector.broadcast %8 : vector<1x128xf32> to vector<8x128xf32>
    %494 = arith.mulf %492, %493 : vector<8x128xf32>
    %495 = arith.addf %490, %494 : vector<8x128xf32>
    %496 = vector.extract_strided_slice %495 {offsets = [0, 0], sizes = [8, 96], strides = [1, 1]} : vector<8x128xf32> to vector<8x96xf32>
    %497 = arith.negf %496 : vector<8x96xf32>
    %498 = math.exp %497 : vector<8x96xf32>
    %cst_106 = arith.constant 1.000000e+00 : f32
    %499 = vector.broadcast %cst_106 : f32 to vector<8x96xf32>
    %500 = arith.addf %499, %498 : vector<8x96xf32>
    %501 = arith.divf %499, %500 : vector<8x96xf32>
    %502 = vector.extract_strided_slice %495 {offsets = [0, 96], sizes = [8, 32], strides = [1, 1]} : vector<8x128xf32> to vector<8x32xf32>
    %503 = math.tanh %502 : vector<8x32xf32>
    %504 = vector.extract_strided_slice %501 {offsets = [0, 32], sizes = [8, 32], strides = [1, 1]} : vector<8x96xf32> to vector<8x32xf32>
    %505 = arith.mulf %504, %478 : vector<8x32xf32>
    %506 = vector.extract_strided_slice %501 {offsets = [0, 0], sizes = [8, 32], strides = [1, 1]} : vector<8x96xf32> to vector<8x32xf32>
    %507 = arith.mulf %506, %503 : vector<8x32xf32>
    %508 = arith.addf %505, %507 : vector<8x32xf32>
    %509 = vector.extract_strided_slice %501 {offsets = [0, 64], sizes = [8, 32], strides = [1, 1]} : vector<8x96xf32> to vector<8x32xf32>
    %510 = math.tanh %508 : vector<8x32xf32>
    %511 = arith.mulf %509, %510 : vector<8x32xf32>
    %512 = vector.extract_strided_slice %511 {offsets = [0, 0], sizes = [8, 1], strides = [1, 1]} : vector<8x32xf32> to vector<8x1xf32>
    %cst_107 = arith.constant 0.000000e+00 : f32
    %513 = vector.broadcast %cst_107 : f32 to vector<8x1xf32>
    %514 = arith.maximumf %512, %513 : vector<8x1xf32>
    %515 = vector.shape_cast %514 : vector<8x1xf32> to vector<8x1xf32>
    %516 = vector.broadcast %515 : vector<8x1xf32> to vector<8x128xf32>
    %c4_i32 = arith.constant 4 : i32
    %517 = vector.broadcast %c4_i32 : i32 to vector<8x128xi32>
    %518 = arith.cmpi eq, %366, %517 : vector<8x128xi32>
    %519 = arith.select %518, %516, %489 : vector<8x128xi1>, vector<8x128xf32>
    %520 = vector.extract_strided_slice %365 {offsets = [40, 0], sizes = [8, 128], strides = [1, 1]} : vector<64x128xf32> to vector<8x128xf32>
    %521 = vector.extract_strided_slice %511 {offsets = [0, 0], sizes = [8, 1], strides = [1, 1]} : vector<8x32xf32> to vector<8x1xf32>
    %522 = vector.broadcast %521 : vector<8x1xf32> to vector<8x128xf32>
    %523 = vector.broadcast %8 : vector<1x128xf32> to vector<8x128xf32>
    %524 = arith.mulf %522, %523 : vector<8x128xf32>
    %525 = arith.addf %520, %524 : vector<8x128xf32>
    %526 = vector.extract_strided_slice %525 {offsets = [0, 0], sizes = [8, 96], strides = [1, 1]} : vector<8x128xf32> to vector<8x96xf32>
    %527 = arith.negf %526 : vector<8x96xf32>
    %528 = math.exp %527 : vector<8x96xf32>
    %cst_108 = arith.constant 1.000000e+00 : f32
    %529 = vector.broadcast %cst_108 : f32 to vector<8x96xf32>
    %530 = arith.addf %529, %528 : vector<8x96xf32>
    %531 = arith.divf %529, %530 : vector<8x96xf32>
    %532 = vector.extract_strided_slice %525 {offsets = [0, 96], sizes = [8, 32], strides = [1, 1]} : vector<8x128xf32> to vector<8x32xf32>
    %533 = math.tanh %532 : vector<8x32xf32>
    %534 = vector.extract_strided_slice %531 {offsets = [0, 32], sizes = [8, 32], strides = [1, 1]} : vector<8x96xf32> to vector<8x32xf32>
    %535 = arith.mulf %534, %508 : vector<8x32xf32>
    %536 = vector.extract_strided_slice %531 {offsets = [0, 0], sizes = [8, 32], strides = [1, 1]} : vector<8x96xf32> to vector<8x32xf32>
    %537 = arith.mulf %536, %533 : vector<8x32xf32>
    %538 = arith.addf %535, %537 : vector<8x32xf32>
    %539 = vector.extract_strided_slice %531 {offsets = [0, 64], sizes = [8, 32], strides = [1, 1]} : vector<8x96xf32> to vector<8x32xf32>
    %540 = math.tanh %538 : vector<8x32xf32>
    %541 = arith.mulf %539, %540 : vector<8x32xf32>
    %542 = vector.extract_strided_slice %541 {offsets = [0, 0], sizes = [8, 1], strides = [1, 1]} : vector<8x32xf32> to vector<8x1xf32>
    %cst_109 = arith.constant 0.000000e+00 : f32
    %543 = vector.broadcast %cst_109 : f32 to vector<8x1xf32>
    %544 = arith.maximumf %542, %543 : vector<8x1xf32>
    %545 = vector.shape_cast %544 : vector<8x1xf32> to vector<8x1xf32>
    %546 = vector.broadcast %545 : vector<8x1xf32> to vector<8x128xf32>
    %c5_i32 = arith.constant 5 : i32
    %547 = vector.broadcast %c5_i32 : i32 to vector<8x128xi32>
    %548 = arith.cmpi eq, %366, %547 : vector<8x128xi32>
    %549 = arith.select %548, %546, %519 : vector<8x128xi1>, vector<8x128xf32>
    %550 = vector.extract_strided_slice %365 {offsets = [48, 0], sizes = [8, 128], strides = [1, 1]} : vector<64x128xf32> to vector<8x128xf32>
    %551 = vector.extract_strided_slice %541 {offsets = [0, 0], sizes = [8, 1], strides = [1, 1]} : vector<8x32xf32> to vector<8x1xf32>
    %552 = vector.broadcast %551 : vector<8x1xf32> to vector<8x128xf32>
    %553 = vector.broadcast %8 : vector<1x128xf32> to vector<8x128xf32>
    %554 = arith.mulf %552, %553 : vector<8x128xf32>
    %555 = arith.addf %550, %554 : vector<8x128xf32>
    %556 = vector.extract_strided_slice %555 {offsets = [0, 0], sizes = [8, 96], strides = [1, 1]} : vector<8x128xf32> to vector<8x96xf32>
    %557 = arith.negf %556 : vector<8x96xf32>
    %558 = math.exp %557 : vector<8x96xf32>
    %cst_110 = arith.constant 1.000000e+00 : f32
    %559 = vector.broadcast %cst_110 : f32 to vector<8x96xf32>
    %560 = arith.addf %559, %558 : vector<8x96xf32>
    %561 = arith.divf %559, %560 : vector<8x96xf32>
    %562 = vector.extract_strided_slice %555 {offsets = [0, 96], sizes = [8, 32], strides = [1, 1]} : vector<8x128xf32> to vector<8x32xf32>
    %563 = math.tanh %562 : vector<8x32xf32>
    %564 = vector.extract_strided_slice %561 {offsets = [0, 32], sizes = [8, 32], strides = [1, 1]} : vector<8x96xf32> to vector<8x32xf32>
    %565 = arith.mulf %564, %538 : vector<8x32xf32>
    %566 = vector.extract_strided_slice %561 {offsets = [0, 0], sizes = [8, 32], strides = [1, 1]} : vector<8x96xf32> to vector<8x32xf32>
    %567 = arith.mulf %566, %563 : vector<8x32xf32>
    %568 = arith.addf %565, %567 : vector<8x32xf32>
    %569 = vector.extract_strided_slice %561 {offsets = [0, 64], sizes = [8, 32], strides = [1, 1]} : vector<8x96xf32> to vector<8x32xf32>
    %570 = math.tanh %568 : vector<8x32xf32>
    %571 = arith.mulf %569, %570 : vector<8x32xf32>
    %572 = vector.extract_strided_slice %571 {offsets = [0, 0], sizes = [8, 1], strides = [1, 1]} : vector<8x32xf32> to vector<8x1xf32>
    %cst_111 = arith.constant 0.000000e+00 : f32
    %573 = vector.broadcast %cst_111 : f32 to vector<8x1xf32>
    %574 = arith.maximumf %572, %573 : vector<8x1xf32>
    %575 = vector.shape_cast %574 : vector<8x1xf32> to vector<8x1xf32>
    %576 = vector.broadcast %575 : vector<8x1xf32> to vector<8x128xf32>
    %c6_i32 = arith.constant 6 : i32
    %577 = vector.broadcast %c6_i32 : i32 to vector<8x128xi32>
    %578 = arith.cmpi eq, %366, %577 : vector<8x128xi32>
    %579 = arith.select %578, %576, %549 : vector<8x128xi1>, vector<8x128xf32>
    %580 = vector.extract_strided_slice %365 {offsets = [56, 0], sizes = [8, 128], strides = [1, 1]} : vector<64x128xf32> to vector<8x128xf32>
    %581 = vector.extract_strided_slice %571 {offsets = [0, 0], sizes = [8, 1], strides = [1, 1]} : vector<8x32xf32> to vector<8x1xf32>
    %582 = vector.broadcast %581 : vector<8x1xf32> to vector<8x128xf32>
    %583 = vector.broadcast %8 : vector<1x128xf32> to vector<8x128xf32>
    %584 = arith.mulf %582, %583 : vector<8x128xf32>
    %585 = arith.addf %580, %584 : vector<8x128xf32>
    %586 = vector.extract_strided_slice %585 {offsets = [0, 0], sizes = [8, 96], strides = [1, 1]} : vector<8x128xf32> to vector<8x96xf32>
    %587 = arith.negf %586 : vector<8x96xf32>
    %588 = math.exp %587 : vector<8x96xf32>
    %cst_112 = arith.constant 1.000000e+00 : f32
    %589 = vector.broadcast %cst_112 : f32 to vector<8x96xf32>
    %590 = arith.addf %589, %588 : vector<8x96xf32>
    %591 = arith.divf %589, %590 : vector<8x96xf32>
    %592 = vector.extract_strided_slice %585 {offsets = [0, 96], sizes = [8, 32], strides = [1, 1]} : vector<8x128xf32> to vector<8x32xf32>
    %593 = math.tanh %592 : vector<8x32xf32>
    %594 = vector.extract_strided_slice %591 {offsets = [0, 32], sizes = [8, 32], strides = [1, 1]} : vector<8x96xf32> to vector<8x32xf32>
    %595 = arith.mulf %594, %568 : vector<8x32xf32>
    %596 = vector.extract_strided_slice %591 {offsets = [0, 0], sizes = [8, 32], strides = [1, 1]} : vector<8x96xf32> to vector<8x32xf32>
    %597 = arith.mulf %596, %593 : vector<8x32xf32>
    %598 = arith.addf %595, %597 : vector<8x32xf32>
    %599 = vector.extract_strided_slice %591 {offsets = [0, 64], sizes = [8, 32], strides = [1, 1]} : vector<8x96xf32> to vector<8x32xf32>
    %600 = math.tanh %598 : vector<8x32xf32>
    %601 = arith.mulf %599, %600 : vector<8x32xf32>
    %602 = vector.extract_strided_slice %601 {offsets = [0, 0], sizes = [8, 1], strides = [1, 1]} : vector<8x32xf32> to vector<8x1xf32>
    %cst_113 = arith.constant 0.000000e+00 : f32
    %603 = vector.broadcast %cst_113 : f32 to vector<8x1xf32>
    %604 = arith.maximumf %602, %603 : vector<8x1xf32>
    %605 = vector.shape_cast %604 : vector<8x1xf32> to vector<8x1xf32>
    %606 = vector.broadcast %605 : vector<8x1xf32> to vector<8x128xf32>
    %c7_i32 = arith.constant 7 : i32
    %607 = vector.broadcast %c7_i32 : i32 to vector<8x128xi32>
    %608 = arith.cmpi eq, %366, %607 : vector<8x128xi32>
    %609 = arith.select %608, %606, %579 : vector<8x128xi1>, vector<8x128xf32>
    %c0_114 = arith.constant 0 : index
    %c0_115 = arith.constant 0 : index
    %610 = vector.load %arg3[%c0_114, %c0_115] : memref<8x128xf32, #tpu.memory_space<vmem>>, vector<8x128xf32>
    tpu.vector_store %arg3[%c0_114, %c0_115], %609 {strides = array<i32>} : memref<8x128xf32, #tpu.memory_space<vmem>>, vector<8x128xf32>,
    return
  }
}

</mosaic_0001>

<bundles_post_ra>
// kernel: model_forward.1
= control target key start
LH: loop header
LB: loop body
LE: loop exit
PB: predicated region body
PF: predicated region fallthrough
CT: control target
= control target key end

     0   :  { %v3211_v3 = vmov 0.0   ;;  %vm61_vm0 = vcmask 130048   ;;  %vm306_vm1 = vcmask 261120   ;;  %vm308_vm2 = vcmask 523520   ;;  %s3215_s12 = smov 32   ;;  %s3748_s1 = inlined_call_operand.vmem [shape: f32[80,256], index: 1, kind: input, shape index: {}]   ;;  %s3749_s0 = inlined_call_operand.vmem [shape: f32[64,16], index: 0, kind: input, shape index: {}]   ;;  %s3750_s2 = inlined_call_operand.vmem [shape: f32[152,128], index: 2, kind: input, shape index: {}]   ;;  %s3751_s3 = inlined_call_operand.vmem [shape: f32[8,128], index: 3, kind: output, shape index: {}]  }
   0x1   :  { %v27_v0 = vld [vmem:[%s3748_s1 + $0x28] sm:$0xff]  ;;  %v29_v1 = vld [vmem:[%s3748_s1 + $0x38] sm:$0xff]  ;;  %v26_v2 = vld [vmem:[%s3748_s1 + $0x20] sm:$0xff]  ;;  %150 = vmatprep.mubr.f32.mxu1 %v3211_v3  ;;  %267 = vmatprep.mubr.f32.mxu0 %v3211_v3  ;;  %vm199_vm3 = vcmask 523264   ;;  %vm3214_vm4 = vmmov 0  }
   0x2   :  { %v3248_v4 = vpack.c.bf16 %v29_v1, %v27_v0  ;;  %v28_v5 = vld [vmem:[%s3748_s1 + $0x30] sm:$0xff]  ;;  %v31_v6 = vld [vmem:[%s3748_s1 + $0x48] sm:$0xff]  ;;  %v33_v7 = vld [vmem:[%s3748_s1 + $0x58] sm:$0xff] }
   0x3   :  { %v3259_v8 = vpack.c.bf16 %v28_v5, %v26_v2  ;;  %v3261_v9 = vpack.c.bf16 %v33_v7, %v31_v6  ;;  %v30_v10 = vld [vmem:[%s3748_s1 + $0x40] sm:$0xff]  ;;  %v32_v11 = vld [vmem:[%s3748_s1 + $0x50] sm:$0xff]  ;;  %v35_v12 = vld [vmem:[%s3748_s1 + $0x68] sm:$0xff] }
   0x4   :  { %2764 = vmatprep.subr.bf16.mxu0 %v3248_v4  ;;  %v37_v13 = vld [vmem:[%s3748_s1 + $0x78] sm:$0xff]  ;;  %v3277_v14 = vpack.c.bf16 %v32_v11, %v30_v10  ;;  %v23_v15 = vld [vmem:[%s3748_s1 + $0x8] sm:$0xff]  ;;  %v22_v17 = vld [vmem:[%s3748_s1] sm:$0xff] }
   0x5   :  { %2766 = vmatpush1.bf16.msra.mxu0 %v3259_v8  ;;  %v25_v16 = vld [vmem:[%s3748_s1 + $0x18] sm:$0xff]  ;;  %v3289_v18 = vpack.c.bf16 %v37_v13, %v35_v12  ;;  %v34_v19 = vld [vmem:[%s3748_s1 + $0x60] sm:$0xff]  ;;  %v36_v20 = vld [vmem:[%s3748_s1 + $0x70] sm:$0xff] }
   0x6   :  { %2768 = vmatprep.subr.bf16.mxu0 %v3261_v9  ;;  %v2759_v21 = vpack.c.bf16 %v25_v16, %v23_v15  ;;  %v24_v22 = vld [vmem:[%s3748_s1 + $0x10] sm:$0xff]  ;;  %v39_v24 = vld [vmem:[%s3748_s1 + $0x88] sm:$0xff]  ;;  %v41_v25 = vld [vmem:[%s3748_s1 + $0x98] sm:$0xff]  ;;  %v3307_v26 = vpack.c.bf16 %v36_v20, %v34_v19 }
   0x7   :  { %v2761_v23 = vpack.c.bf16 %v24_v22, %v22_v17  ;;  %v14_v27 = vld [vmem:[%s3749_s0] sm:$0xff]  ;;  %v3313_v28 = vpack.c.bf16 %v41_v25, %v39_v24  ;;  %v40_v30 = vld [vmem:[%s3748_s1 + $0x90] sm:$0xff]  ;;  %v15_v48 = vld [vmem:[%s3749_s0 + $0x8] sm:$0xff] }
   0x8   :  { %2760 = vmatprep.subr.bf16.mxu1 %v2759_v21  ;;  %v38_v29 = vld [vmem:[%s3748_s1 + $0x80] sm:$0xff]  ;;  %s3212_s1 = smov 64   ;;  %v16_v12 = vld [vmem:[%s3749_s0 + $0x10] sm:$0xff] }
   0x9   :  { %2770 = vmatpush1.bf16.msra.mxu0 %v3277_v14  ;;  %2762 = vmatpush1.bf16.msra.mxu1 %v2761_v23  ;;  %v3323_v31 = vpack.c.bf16 %v40_v30, %v38_v29 }
   0xa   :  { %2772 = vmatprep.subr.bf16.mxu0 %v3289_v18 }
   0xc   :  { %2482 = vmatmul.mubr.msk.f32.vlgmr.msra.gmra.mrb[0].mxu1 %vm61_vm0, %v14_v27 }
   0xd   :  { %2774 = vmatpush1.bf16.msra.mxu0 %v3307_v26  ;;  %156 = vmatprep.mubr.f32.mxu1 %v3211_v3 }
   0xe   :  { %2776 = vmatprep.subr.bf16.mxu0 %v3313_v28 }
  0x10   :  { %2483 = vmatmul.mubr.msk.f32.gmra.mrb[2].mxu1 %vm61_vm0, %v15_v48 }
  0x11   :  { %2778 = vmatpush1.bf16.msra.mxu0 %v3323_v31  ;;  %162 = vmatprep.mubr.f32.mxu1 %v3211_v3 }
  0x12   :  { %2780 = vmatprep.subr.bf16.mxu0 %v3248_v4 }
  0x14   :  { %268 = vmatmul.mubr.f32.vlgmr.msra.gmra.mrb[0].mxu0 %v3211_v3  ;;  %2484 = vmatmul.mubr.msk.f32.gmra.mrb[4].mxu1 %vm61_vm0, %v16_v12 }
  0x15   :  { %2782 = vmatpush1.bf16.msra.mxu0 %v3259_v8  ;;  %377 = vmatprep.mubr.f32.mxu0 %v3211_v3 }
  0x16   :  { %2784 = vmatprep.subr.bf16.mxu0 %v3261_v9  ;;  %168 = vmatprep.mubr.f32.mxu1 %v3211_v3 }
  0x19   :  { %2786 = vmatpush1.bf16.msra.mxu0 %v3277_v14 }
  0x1a   :  { %2788 = vmatprep.subr.bf16.mxu0 %v3289_v18 }
  0x1d   :  { %2790 = vmatpush1.bf16.msra.mxu0 %v3307_v26 }
  0x1e   :  { %2792 = vmatprep.subr.bf16.mxu0 %v3313_v28 }
  0x21   :  { %2794 = vmatpush1.bf16.msra.mxu0 %v3323_v31 }
  0x22   :  { %2796 = vmatprep.subr.bf16.mxu0 %v3248_v4 }
  0xdf   :  { %v152_v32 = vpop.f32.mrb[0].mxu1 }
  0xe0   :  { %v154_v33 = vpop.f32.mrb[1].mxu1 }
  0xe3   :  { %v158_v56 = vpop.f32.mrb[2].mxu1 }
  0xe4   :  { %v160_v57 = vpop.f32.mrb[3].mxu1 }
  0xe7   :  { %v269_v34 = vpop.f32.mrb[0].mxu0  ;;  %v164_v22 = vpop.f32.mrb[4].mxu1 }
  0xe8   :  { %v274_v35 = vadd.f32 %v269_v34, %v152_v32  ;;  %v271_v36 = vpop.f32.mrb[1].mxu0  ;;  %v166_v23 = vpop.f32.mrb[5].mxu1 }
  0xe9   :  { %v275_v37 = vadd.f32 %v271_v36, %v154_v33 }
  0xea   :  { %v2490_v39 = vmul.f32 -1.442695, %v274_v35 }
  0xeb   :  { %2987 = vtanh.f32 %v275_v37  ;;  %v2491_v50 = vmul.f32 -1.442695, %v275_v37 }
  0xec   :  { %2989 = vpow2.f32 %v2490_v39 }
  0xf5   :  { %v2988_v38 = vpop.eup %2987 }
  0xf6   :  { %291 = vrot.lane.b32.xlu0 %v2988_v38, %s3212_s1  ;;  %v2990_v40 = vpop.eup %2989 }
  0xf7   :  { %v282_v41 = vadd.f32 1.0, %v2990_v40 }
  0xf9   :  { %2991 = vrcp.f32 %v282_v41  ;;  %v17_v41 = vld [vmem:[%s3749_s0 + $0x18] sm:$0xff] }
  0xfa   :  { %2485 = vmatmul.mubr.msk.f32.gmra.mrb[6].mxu1 %vm61_vm0, %v17_v41 }
  0xfb   :  { %174 = vmatprep.mubr.f32.mxu1 %v3211_v3 }
 0x103   :  { %v2992_v42 = vpop.eup %2991 }
 0x104   :  { %v289_v45 = vmul.f32 0.0, %v2992_v42 }
 0x168   :  { %v292_v43 = vpop.permute.xlu0 %291 }
 0x169   :  { %v294_v44 = vmul.f32 %v2992_v42, %v292_v43 }
 0x16b   :  { %296 = vrot.lane.b32.xlu0 %v294_v44, %s3212_s1 }
 0x1dd   :  { %v297_v46 = vpop.permute.xlu0 %296 }
 0x1de   :  { %v299_v47 = vadd.f32 %v297_v46, %v289_v45 }
 0x1e0   :  { %2993 = vtanh.f32 %v299_v47 }
 0x1e1   :  { %2995 = vpow2.f32 %v2491_v50 }
 0x1ea   :  { %v2994_v49 = vpop.eup %2993 }
 0x1eb   :  { %302 = vrot.lane.b32.xlu1 %v2994_v49, %s3212_s1  ;;  %v2996_v51 = vpop.eup %2995  ;;  %v170_v49 = vpop.f32.mrb[6].mxu1 }
 0x1ec   :  { %v283_v52 = vadd.f32 1.0, %v2996_v51  ;;  %v172_v50 = vpop.f32.mrb[7].mxu1 }
 0x1ee   :  { %2997 = vrcp.f32 %v283_v52 }
 0x1f8   :  { %v2998_v53 = vpop.eup %2997 }
 0x25d   :  { %v303_v54 = vpop.permute.xlu1 %302 }
 0x25e   :  { %v305_v55 = vmul.f32 %v2998_v53, %v303_v54 }
 0x260   :  { %307 = vst.msk [vmem:[#allocation2] sm:$0xff] %vm306_vm1, %v305_v55  ;;  %2492 = vmatmul.mubr.msk.f32.vlgmr.msra.gmra.mrb[2].mxu0 %vm199_vm3, %v305_v55 }
 0x261   :  { %309 = vst.msk [vmem:[#allocation2 + $0x38] sm:$0xff] %vm308_vm2, %v305_v55  ;;  %2798 = vmatpush1.bf16.msra.mxu0 %v3259_v8  ;;  %485 = vmatprep.mubr.f32.mxu0 %v3211_v3 }
 0x262   :  { %2800 = vmatprep.subr.bf16.mxu0 %v3261_v9 }
 0x265   :  { %2802 = vmatpush1.bf16.msra.mxu0 %v3277_v14 }
 0x266   :  { %2804 = vmatprep.subr.bf16.mxu0 %v3289_v18 }
 0x269   :  { %2806 = vmatpush1.bf16.msra.mxu0 %v3307_v26 }
 0x26a   :  { %2808 = vmatprep.subr.bf16.mxu0 %v3313_v28 }
 0x26d   :  { %2810 = vmatpush1.bf16.msra.mxu0 %v3323_v31 }
 0x26e   :  { %2812 = vmatprep.subr.bf16.mxu0 %v3248_v4 }
 0x333   :  { %v379_v58 = vpop.f32.mrb[2].mxu0 }
 0x334   :  { %v384_v59 = vadd.f32 %v379_v58, %v158_v56  ;;  %v381_v60 = vpop.f32.mrb[3].mxu0 }
 0x335   :  { %v385_v61 = vadd.f32 %v381_v60, %v160_v57 }
 0x336   :  { %v2493_v63 = vmul.f32 -1.442695, %v384_v59 }
 0x337   :  { %2999 = vtanh.f32 %v385_v61  ;;  %v2494_v15 = vmul.f32 -1.442695, %v385_v61 }
 0x338   :  { %3001 = vpow2.f32 %v2493_v63 }
 0x341   :  { %v3000_v62 = vpop.eup %2999 }
 0x342   :  { %401 = vrot.lane.b32.xlu1 %v3000_v62, %s3212_s1  ;;  %v3002_v0 = vpop.eup %3001 }
 0x343   :  { %v392_v1 = vadd.f32 1.0, %v3002_v0 }
 0x345   :  { %3003 = vrcp.f32 %v392_v1  ;;  %v18_v1 = vld [vmem:[%s3749_s0 + $0x20] sm:$0xff] }
 0x346   :  { %2486 = vmatmul.mubr.msk.f32.gmra.mrb[8].mxu1 %vm61_vm0, %v18_v1 }
 0x347   :  { %180 = vmatprep.mubr.f32.mxu1 %v3211_v3 }
 0x34f   :  { %v3004_v2 = vpop.eup %3003 }
 0x350   :  { %v399_v7 = vmul.f32 %v3004_v2, %v299_v47 }
 0x3b4   :  { %v402_v5 = vpop.permute.xlu1 %401 }
 0x3b5   :  { %v404_v6 = vmul.f32 %v3004_v2, %v402_v5 }
 0x3b7   :  { %406 = vrot.lane.b32.xlu0 %v404_v6, %s3212_s1 }
 0x429   :  { %v407_v10 = vpop.permute.xlu0 %406 }
 0x42a   :  { %v409_v11 = vadd.f32 %v407_v10, %v399_v7 }
 0x42c   :  { %3005 = vtanh.f32 %v409_v11 }
 0x42d   :  { %3007 = vpow2.f32 %v2494_v15 }
 0x436   :  { %v3006_v13 = vpop.eup %3005 }
 0x437   :  { %412 = vrot.lane.b32.xlu1 %v3006_v13, %s3212_s1  ;;  %v3008_v16 = vpop.eup %3007  ;;  %v176_v13 = vpop.f32.mrb[8].mxu1 }
 0x438   :  { %v393_v17 = vadd.f32 1.0, %v3008_v16  ;;  %v178_v15 = vpop.f32.mrb[9].mxu1 }
 0x43a   :  { %3009 = vrcp.f32 %v393_v17 }
 0x444   :  { %v3010_v19 = vpop.eup %3009 }
 0x4a9   :  { %v413_v20 = vpop.permute.xlu1 %412 }
 0x4aa   :  { %v415_v21 = vmul.f32 %v3010_v19, %v413_v20 }
 0x4ac   :  { %416 = vst.msk [vmem:[#allocation2 + $0x8] sm:$0xff] %vm306_vm1, %v415_v21  ;;  %2495 = vmatmul.mubr.msk.f32.vlgmr.msra.gmra.mrb[4].mxu0 %vm199_vm3, %v415_v21 }
 0x4ad   :  { %417 = vst.msk [vmem:[#allocation2 + $0x30] sm:$0xff] %vm308_vm2, %v415_v21  ;;  %2814 = vmatpush1.bf16.msra.mxu0 %v3259_v8  ;;  %593 = vmatprep.mubr.f32.mxu0 %v3211_v3 }
 0x4ae   :  { %2816 = vmatprep.subr.bf16.mxu0 %v3261_v9 }
 0x4b1   :  { %2818 = vmatpush1.bf16.msra.mxu0 %v3277_v14 }
 0x4b2   :  { %2820 = vmatprep.subr.bf16.mxu0 %v3289_v18 }
 0x4b5   :  { %2822 = vmatpush1.bf16.msra.mxu0 %v3307_v26 }
 0x4b6   :  { %2824 = vmatprep.subr.bf16.mxu0 %v3313_v28 }
 0x4b9   :  { %2826 = vmatpush1.bf16.msra.mxu0 %v3323_v31 }
 0x4ba   :  { %2828 = vmatprep.subr.bf16.mxu0 %v3248_v4 }
 0x57f   :  { %v487_v24 = vpop.f32.mrb[4].mxu0 }
 0x580   :  { %v492_v25 = vadd.f32 %v487_v24, %v164_v22  ;;  %v489_v27 = vpop.f32.mrb[5].mxu0 }
 0x581   :  { %v493_v29 = vadd.f32 %v489_v27, %v166_v23 }
 0x582   :  { %v2496_v32 = vmul.f32 -1.442695, %v492_v25 }
 0x583   :  { %3011 = vtanh.f32 %v493_v29  ;;  %v2497_v43 = vmul.f32 -1.442695, %v493_v29 }
 0x584   :  { %3013 = vpow2.f32 %v2496_v32 }
 0x58d   :  { %v3012_v30 = vpop.eup %3011 }
 0x58e   :  { %509 = vrot.lane.b32.xlu0 %v3012_v30, %s3212_s1  ;;  %v3014_v33 = vpop.eup %3013 }
 0x58f   :  { %v500_v34 = vadd.f32 1.0, %v3014_v33 }
 0x591   :  { %3015 = vrcp.f32 %v500_v34  ;;  %v19_v34 = vld [vmem:[%s3749_s0 + $0x28] sm:$0xff] }
 0x592   :  { %2487 = vmatmul.mubr.msk.f32.gmra.mrb[10].mxu1 %vm61_vm0, %v19_v34 }
 0x593   :  { %186 = vmatprep.mubr.f32.mxu1 %v3211_v3 }
 0x59b   :  { %v3016_v35 = vpop.eup %3015 }
 0x59c   :  { %v507_v38 = vmul.f32 %v3016_v35, %v409_v11 }
 0x600   :  { %v510_v36 = vpop.permute.xlu0 %509 }
 0x601   :  { %v512_v37 = vmul.f32 %v3016_v35, %v510_v36 }
 0x603   :  { %514 = vrot.lane.b32.xlu1 %v512_v37, %s3212_s1 }
 0x675   :  { %v515_v39 = vpop.permute.xlu1 %514 }
 0x676   :  { %v517_v40 = vadd.f32 %v515_v39, %v507_v38 }
 0x678   :  { %3017 = vtanh.f32 %v517_v40 }
 0x679   :  { %3019 = vpow2.f32 %v2497_v43 }
 0x682   :  { %v3018_v42 = vpop.eup %3017 }
 0x683   :  { %520 = vrot.lane.b32.xlu0 %v3018_v42, %s3212_s1  ;;  %v3020_v44 = vpop.eup %3019  ;;  %v182_v42 = vpop.f32.mrb[10].mxu1 }
 0x684   :  { %v501_v45 = vadd.f32 1.0, %v3020_v44  ;;  %v184_v43 = vpop.f32.mrb[11].mxu1 }
 0x686   :  { %3021 = vrcp.f32 %v501_v45 }
 0x690   :  { %v3022_v46 = vpop.eup %3021 }
 0x6f5   :  { %v521_v47 = vpop.permute.xlu0 %520 }
 0x6f6   :  { %v523_v48 = vmul.f32 %v3022_v46, %v521_v47 }
 0x6f8   :  { %524 = vst.msk [vmem:[#allocation2 + $0x10] sm:$0xff] %vm306_vm1, %v523_v48  ;;  %2498 = vmatmul.mubr.msk.f32.vlgmr.msra.gmra.mrb[6].mxu0 %vm199_vm3, %v523_v48 }
 0x6f9   :  { %525 = vst.msk [vmem:[#allocation2 + $0x28] sm:$0xff] %vm308_vm2, %v523_v48  ;;  %2830 = vmatpush1.bf16.msra.mxu0 %v3259_v8  ;;  %701 = vmatprep.mubr.f32.mxu0 %v3211_v3 }
 0x6fa   :  { %2832 = vmatprep.subr.bf16.mxu0 %v3261_v9 }
 0x6fd   :  { %2834 = vmatpush1.bf16.msra.mxu0 %v3277_v14 }
 0x6fe   :  { %2836 = vmatprep.subr.bf16.mxu0 %v3289_v18 }
 0x701   :  { %2838 = vmatpush1.bf16.msra.mxu0 %v3307_v26 }
 0x702   :  { %2840 = vmatprep.subr.bf16.mxu0 %v3313_v28 }
 0x705   :  { %2842 = vmatpush1.bf16.msra.mxu0 %v3323_v31 }
 0x706   :  { %2844 = vmatprep.subr.bf16.mxu0 %v3248_v4 }
 0x7cb   :  { %v595_v51 = vpop.f32.mrb[6].mxu0 }
 0x7cc   :  { %v600_v52 = vadd.f32 %v595_v51, %v170_v49  ;;  %v597_v53 = vpop.f32.mrb[7].mxu0 }
 0x7cd   :  { %v601_v54 = vadd.f32 %v597_v53, %v172_v50 }
 0x7ce   :  { %v2499_v56 = vmul.f32 -1.442695, %v600_v52 }
 0x7cf   :  { %3023 = vtanh.f32 %v601_v54  ;;  %v2500_v5 = vmul.f32 -1.442695, %v601_v54 }
 0x7d0   :  { %3025 = vpow2.f32 %v2499_v56 }
 0x7d9   :  { %v3024_v55 = vpop.eup %3023 }
 0x7da   :  { %617 = vrot.lane.b32.xlu1 %v3024_v55, %s3212_s1  ;;  %v3026_v57 = vpop.eup %3025 }
 0x7db   :  { %v608_v58 = vadd.f32 1.0, %v3026_v57  ;;  %v20_v57 = vld [vmem:[%s3749_s0 + $0x30] sm:$0xff] }
 0x7dc   :  { %2488 = vmatmul.mubr.msk.f32.gmra.mrb[12].mxu1 %vm61_vm0, %v20_v57 }
 0x7dd   :  { %3027 = vrcp.f32 %v608_v58  ;;  %192 = vmatprep.mubr.f32.mxu1 %v3211_v3 }
 0x7e7   :  { %v3028_v59 = vpop.eup %3027 }
 0x7e8   :  { %v615_v62 = vmul.f32 %v3028_v59, %v517_v40 }
 0x84c   :  { %v618_v60 = vpop.permute.xlu1 %617 }
 0x84d   :  { %v620_v61 = vmul.f32 %v3028_v59, %v618_v60 }
 0x84f   :  { %622 = vrot.lane.b32.xlu0 %v620_v61, %s3212_s1 }
 0x8af   :  { %v188_v1 = vpop.f32.mrb[12].mxu1 }
 0x8c1   :  { %v623_v63 = vpop.permute.xlu0 %622 }
 0x8c2   :  { %v625_v0 = vadd.f32 %v623_v63, %v615_v62 }
 0x8c4   :  { %3029 = vtanh.f32 %v625_v0 }
 0x8c5   :  { %3031 = vpow2.f32 %v2500_v5 }
 0x8ce   :  { %v3030_v2 = vpop.eup %3029 }
 0x8cf   :  { %628 = vrot.lane.b32.xlu1 %v3030_v2, %s3212_s1  ;;  %v3032_v6 = vpop.eup %3031  ;;  %v190_v2 = vpop.f32.mrb[13].mxu1 }
 0x8d0   :  { %v609_v7 = vadd.f32 1.0, %v3032_v6 }
 0x8d2   :  { %3033 = vrcp.f32 %v609_v7 }
 0x8dc   :  { %v3034_v10 = vpop.eup %3033 }
 0x941   :  { %v629_v11 = vpop.permute.xlu1 %628 }
 0x942   :  { %v631_v12 = vmul.f32 %v3034_v10, %v629_v11 }
 0x944   :  { %632 = vst.msk [vmem:[#allocation2 + $0x18] sm:$0xff] %vm306_vm1, %v631_v12  ;;  %2501 = vmatmul.mubr.msk.f32.vlgmr.msra.gmra.mrb[8].mxu0 %vm199_vm3, %v631_v12 }
 0x945   :  { %633 = vst.msk [vmem:[#allocation2 + $0x20] sm:$0xff] %vm308_vm2, %v631_v12  ;;  %2846 = vmatpush1.bf16.msra.mxu0 %v3259_v8  ;;  %809 = vmatprep.mubr.f32.mxu0 %v3211_v3 }
 0x946   :  { %2848 = vmatprep.subr.bf16.mxu0 %v3261_v9 }
 0x949   :  { %2850 = vmatpush1.bf16.msra.mxu0 %v3277_v14 }
 0x94a   :  { %2852 = vmatprep.subr.bf16.mxu0 %v3289_v18 }
 0x94d   :  { %2854 = vmatpush1.bf16.msra.mxu0 %v3307_v26 }
 0x94e   :  { %2856 = vmatprep.subr.bf16.mxu0 %v3313_v28 }
 0x951   :  { %2858 = vmatpush1.bf16.msra.mxu0 %v3323_v31 }
 0x952   :  { %2860 = vmatprep.subr.bf16.mxu0 %v3248_v4 }
 0xa17   :  { %v703_v16 = vpop.f32.mrb[8].mxu0 }
 0xa18   :  { %v708_v17 = vadd.f32 %v703_v16, %v176_v13  ;;  %v705_v19 = vpop.f32.mrb[9].mxu0 }
 0xa19   :  { %v709_v20 = vadd.f32 %v705_v19, %v178_v15  ;;  %v21_v15 = vld [vmem:[%s3749_s0 + $0x38] sm:$0xff] }
 0xa1a   :  { %v2502_v22 = vmul.f32 -1.442695, %v708_v17  ;;  %2489 = vmatmul.mubr.msk.f32.gmra.mrb[14].mxu1 %vm61_vm0, %v21_v15 }
 0xa1b   :  { %3035 = vtanh.f32 %v709_v20  ;;  %v2503_v36 = vmul.f32 -1.442695, %v709_v20 }
 0xa1c   :  { %3037 = vpow2.f32 %v2502_v22 }
 0xa25   :  { %v3036_v21 = vpop.eup %3035 }
 0xa26   :  { %725 = vrot.lane.b32.xlu0 %v3036_v21, %s3212_s1  ;;  %v3038_v23 = vpop.eup %3037 }
 0xa27   :  { %v716_v24 = vadd.f32 1.0, %v3038_v23 }
 0xa29   :  { %3039 = vrcp.f32 %v716_v24 }
 0xa33   :  { %v3040_v25 = vpop.eup %3039 }
 0xa34   :  { %v723_v30 = vmul.f32 %v3040_v25, %v625_v0 }
 0xa98   :  { %v726_v27 = vpop.permute.xlu0 %725 }
 0xa99   :  { %v728_v29 = vmul.f32 %v3040_v25, %v726_v27 }
 0xa9b   :  { %730 = vrot.lane.b32.xlu1 %v728_v29, %s3212_s1 }
 0xaed   :  { %v194_v24 = vpop.f32.mrb[14].mxu1 }
 0xaee   :  { %v196_v25 = vpop.f32.mrb[15].mxu1 }
 0xb0d   :  { %v731_v32 = vpop.permute.xlu1 %730 }
 0xb0e   :  { %v733_v33 = vadd.f32 %v731_v32, %v723_v30 }
 0xb10   :  { %3041 = vtanh.f32 %v733_v33 }
 0xb11   :  { %3043 = vpow2.f32 %v2503_v36 }
 0xb1a   :  { %v3042_v35 = vpop.eup %3041 }
 0xb1b   :  { %736 = vrot.lane.b32.xlu0 %v3042_v35, %s3212_s1  ;;  %v3044_v37 = vpop.eup %3043 }
 0xb1c   :  { %v717_v38 = vadd.f32 1.0, %v3044_v37 }
 0xb1e   :  { %3045 = vrcp.f32 %v717_v38 }
 0xb28   :  { %v3046_v39 = vpop.eup %3045 }
 0xb8d   :  { %v737_v40 = vpop.permute.xlu0 %736 }
 0xb8e   :  { %v739_v41 = vmul.f32 %v3046_v39, %v737_v40  ;;  %v42_v40 = vld [vmem:[%s3750_s2] sm:$0xff] }
 0xb90   :  { %740 = vst.msk [vmem:[#allocation2 + $0x20] sm:$0xff] %vm306_vm1, %v739_v41  ;;  %2504 = vmatmul.mubr.msk.f32.vlgmr.msra.gmra.mrb[10].mxu0 %vm199_vm3, %v739_v41 }
 0xb91   :  { %741 = vst.msk [vmem:[#allocation2 + $0x18] sm:$0xff] %vm308_vm2, %v739_v41  ;;  %2862 = vmatpush1.bf16.msra.mxu0 %v3259_v8  ;;  %917 = vmatprep.mubr.f32.mxu0 %v3211_v3  ;;  %v43_v41 = vld [vmem:[%s3750_s2 + $0x8] sm:$0xff] }
 0xb92   :  { %2864 = vmatprep.subr.bf16.mxu0 %v3261_v9 }
 0xb95   :  { %2866 = vmatpush1.bf16.msra.mxu0 %v3277_v14 }
 0xb96   :  { %2868 = vmatprep.subr.bf16.mxu0 %v3289_v18 }
 0xb99   :  { %2870 = vmatpush1.bf16.msra.mxu0 %v3307_v26 }
 0xb9a   :  { %2872 = vmatprep.subr.bf16.mxu0 %v3313_v28 }
 0xb9d   :  { %2874 = vmatpush1.bf16.msra.mxu0 %v3323_v31 }
 0xb9e   :  { %2876 = vmatprep.subr.bf16.mxu0 %v3248_v4 }
 0xc63   :  { %v811_v44 = vpop.f32.mrb[10].mxu0 }
 0xc64   :  { %v816_v45 = vadd.f32 %v811_v44, %v182_v42  ;;  %v813_v46 = vpop.f32.mrb[11].mxu0  ;;  %v44_v42 = vld [vmem:[%s3750_s2 + $0x10] sm:$0xff]  ;;  %v45_v44 = vld [vmem:[%s3750_s2 + $0x18] sm:$0xff] }
 0xc65   :  { %v817_v47 = vadd.f32 %v813_v46, %v184_v43  ;;  %v2891_v43 = vpack.c.bf16 %v43_v41, %v42_v40  ;;  %v46_v46 = vld [vmem:[%s3750_s2 + $0x20] sm:$0xff] }
 0xc66   :  { %v2505_v49 = vmul.f32 -1.442695, %v816_v45  ;;  %v2895_v45 = vpack.c.bf16 %v45_v44, %v44_v42 }
 0xc67   :  { %3047 = vtanh.f32 %v817_v47  ;;  %v2506_v59 = vmul.f32 -1.442695, %v817_v47  ;;  %v47_v47 = vld [vmem:[%s3750_s2 + $0x28] sm:$0xff]  ;;  %2892 = vmatprep.subr.bf16.mxu1 %v2891_v43 }
 0xc68   :  { %3049 = vpow2.f32 %v2505_v49  ;;  %2894 = vmatpush3.bf16.msra.mxu1 %v2891_v43 }
 0xc69   :  { %2896 = vmatprep.subr.bf16.mxu1 %v2895_v45 }
 0xc6c   :  { %2898 = vmatpush3.bf16.msra.mxu1 %v2895_v45 }
 0xc71   :  { %v3048_v48 = vpop.eup %3047 }
 0xc72   :  { %833 = vrot.lane.b32.xlu1 %v3048_v48, %s3212_s1  ;;  %v3050_v50 = vpop.eup %3049  ;;  %v2899_v48 = vpack.c.bf16 %v47_v47, %v46_v46 }
 0xc73   :  { %v824_v51 = vadd.f32 1.0, %v3050_v50 }
 0xc74   :  { %2900 = vmatprep.subr.bf16.mxu1 %v2899_v48 }
 0xc75   :  { %3051 = vrcp.f32 %v824_v51  ;;  %2902 = vmatpush3.bf16.msra.mxu1 %v2899_v48 }
 0xc7f   :  { %v3052_v52 = vpop.eup %3051 }
 0xc80   :  { %v831_v4 = vmul.f32 %v3052_v52, %v733_v33 }
 0xce4   :  { %v834_v53 = vpop.permute.xlu1 %833 }
 0xce5   :  { %v836_v54 = vmul.f32 %v3052_v52, %v834_v53  ;;  %v48_v52 = vld [vmem:[%s3750_s2 + $0x30] sm:$0xff]  ;;  %v49_v53 = vld [vmem:[%s3750_s2 + $0x38] sm:$0xff] }
 0xce7   :  { %838 = vrot.lane.b32.xlu0 %v836_v54, %s3212_s1  ;;  %v2903_v54 = vpack.c.bf16 %v49_v53, %v48_v52 }
 0xce9   :  { %2904 = vmatprep.subr.bf16.mxu1 %v2903_v54 }
 0xcea   :  { %2906 = vmatpush3.bf16.msra.mxu1 %v2903_v54 }
 0xd59   :  { %v839_v55 = vpop.permute.xlu0 %838 }
 0xd5a   :  { %v841_v56 = vadd.f32 %v839_v55, %v831_v4  ;;  %v3213_v4 = vmov 0.0|0.0  }
 0xd5b   :  { %2907 = vmatprep.subr.bf16.mxu1 %v3213_v4 }
 0xd5c   :  { %3053 = vtanh.f32 %v841_v56 }
 0xd5d   :  { %3055 = vpow2.f32 %v2506_v59 }
 0xd66   :  { %v3054_v58 = vpop.eup %3053 }
 0xd67   :  { %844 = vrot.lane.b32.xlu1 %v3054_v58, %s3212_s1  ;;  %v3056_v60 = vpop.eup %3055 }
 0xd68   :  { %v825_v61 = vadd.f32 1.0, %v3056_v60 }
 0xd6a   :  { %3057 = vrcp.f32 %v825_v61 }
 0xd74   :  { %v3058_v62 = vpop.eup %3057 }
 0xdd9   :  { %v845_v63 = vpop.permute.xlu1 %844 }
 0xdda   :  { %v847_v0 = vmul.f32 %v3058_v62, %v845_v63  ;;  %v50_v62 = vld [vmem:[%s3750_s2 + $0x40] sm:$0xff]  ;;  %v51_v63 = vld [vmem:[%s3750_s2 + $0x48] sm:$0xff] }
 0xddc   :  { %848 = vst.msk [vmem:[#allocation2 + $0x28] sm:$0xff] %vm306_vm1, %v847_v0  ;;  %2507 = vmatmul.mubr.msk.f32.vlgmr.msra.gmra.mrb[12].mxu0 %vm199_vm3, %v847_v0 }
 0xddd   :  { %849 = vst.msk [vmem:[#allocation2 + $0x10] sm:$0xff] %vm308_vm2, %v847_v0  ;;  %2878 = vmatpush1.bf16.msra.mxu0 %v3259_v8  ;;  %1025 = vmatprep.mubr.f32.mxu0 %v3211_v3  ;;  %v3504_v0 = vpack.c.bf16 %v51_v63, %v50_v62 }
 0xdde   :  { %2880 = vmatprep.subr.bf16.mxu0 %v3261_v9 }
 0xde1   :  { %2882 = vmatpush1.bf16.msra.mxu0 %v3277_v14 }
 0xde2   :  { %2884 = vmatprep.subr.bf16.mxu0 %v3289_v18 }
 0xde5   :  { %2886 = vmatpush1.bf16.msra.mxu0 %v3307_v26 }
 0xde6   :  { %2888 = vmatprep.subr.bf16.mxu0 %v3313_v28 }
 0xde9   :  { %2890 = vmatpush1.bf16.msra.mxu0 %v3323_v31 }
 0xeaf   :  { %v919_v5 = vpop.f32.mrb[12].mxu0 }
 0xeb0   :  { %v924_v6 = vadd.f32 %v919_v5, %v188_v1  ;;  %v921_v7 = vpop.f32.mrb[13].mxu0  ;;  %v53_v5 = vld [vmem:[%s3750_s2 + $0x58] sm:$0xff] }
 0xeb1   :  { %v925_v8 = vadd.f32 %v921_v7, %v190_v2  ;;  %v52_v2 = vld [vmem:[%s3750_s2 + $0x50] sm:$0xff] }
 0xeb2   :  { %v2508_v9 = vmul.f32 -1.442695, %v924_v6  ;;  %v1068_v7 = vld [vmem:[#allocation2 + $0x10] sm:$0xff] }
 0xeb3   :  { %3059 = vtanh.f32 %v925_v8  ;;  %v2509_v17 = vmul.f32 -1.442695, %v925_v8  ;;  %v3516_v8 = vpack.c.bf16 %v53_v5, %v52_v2 }
 0xeb4   :  { %3061 = vpow2.f32 %v2508_v9  ;;  %v1070_v9 = vld [vmem:[#allocation2 + $0x20] sm:$0xff] }
 0xebd   :  { %v3060_v10 = vpop.eup %3059 }
 0xebe   :  { %941 = vrot.lane.b32.xlu0 %v3060_v10, %s3212_s1  ;;  %v3062_v14 = vpop.eup %3061  ;;  %v1069_v10 = vld [vmem:[#allocation2 + $0x18] sm:$0xff] }
 0xebf   :  { %v932_v18 = vadd.f32 1.0, %v3062_v14  ;;  %v1071_v14 = vld [vmem:[#allocation2 + $0x28] sm:$0xff] }
 0xec1   :  { %3063 = vrcp.f32 %v932_v18 }
 0xecb   :  { %v3064_v26 = vpop.eup %3063 }
 0xecc   :  { %v939_v31 = vmul.f32 %v3064_v26, %v841_v56 }
 0xf30   :  { %v942_v11 = vpop.permute.xlu0 %941 }
 0xf31   :  { %v944_v28 = vmul.f32 %v3064_v26, %v942_v11  ;;  %v2513_v11 = vld [vmem:[%s3750_s2 + $0x80] ss:$0 sm:$0xff] }
 0xf33   :  { %946 = vrot.lane.b32.xlu1 %v944_v28, %s3212_s1 }
 0xfa5   :  { %v947_v12 = vpop.permute.xlu1 %946 }
 0xfa6   :  { %v949_v13 = vadd.f32 %v947_v12, %v939_v31 }
 0xfa8   :  { %3065 = vtanh.f32 %v949_v13 }
 0xfa9   :  { %3067 = vpow2.f32 %v2509_v17 }
 0xfb2   :  { %v3066_v16 = vpop.eup %3065 }
 0xfb3   :  { %952 = vrot.lane.b32.xlu0 %v3066_v16, %s3212_s1  ;;  %v3068_v19 = vpop.eup %3067 }
 0xfb4   :  { %v933_v20 = vadd.f32 1.0, %v3068_v19 }
 0xfb6   :  { %3069 = vrcp.f32 %v933_v20 }
 0xfc0   :  { %v3070_v21 = vpop.eup %3069 }
0x1025   :  { %v953_v22 = vpop.permute.xlu0 %952 }
0x1026   :  { %v955_v23 = vmul.f32 %v3070_v21, %v953_v22 }
0x1028   :  { %956 = vst.msk [vmem:[#allocation2 + $0x30] sm:$0xff] %vm306_vm1, %v955_v23  ;;  %2510 = vmatmul.mubr.msk.f32.vlgmr.msra.gmra.mrb[14].mxu0 %vm199_vm3, %v955_v23 }
0x1029   :  { %957 = vst.msk [vmem:[#allocation2 + $0x8] sm:$0xff] %vm308_vm2, %v955_v23 }
0x102f   :  { %v1072_v18 = vld [vmem:[#allocation2 + $0x30] sm:$0xff] }
0x1030   :  { %v1067_v6 = vld [vmem:[#allocation2 + $0x8] sm:$0xff] }
0x10fb   :  { %v1027_v27 = vpop.f32.mrb[14].mxu0 }
0x10fc   :  { %v1032_v29 = vadd.f32 %v1027_v27, %v194_v24  ;;  %v1029_v30 = vpop.f32.mrb[15].mxu0 }
0x10fd   :  { %v1033_v32 = vadd.f32 %v1029_v30, %v196_v25 }
0x10fe   :  { %v2511_v34 = vmul.f32 -1.442695, %v1032_v29 }
0x10ff   :  { %3071 = vtanh.f32 %v1033_v32  ;;  %v2512_v56 = vmul.f32 -1.442695, %v1033_v32 }
0x1100   :  { %3073 = vpow2.f32 %v2511_v34 }
0x1109   :  { %v3072_v33 = vpop.eup %3071 }
0x110a   :  { %1049 = vrot.lane.b32.xlu1 %v3072_v33, %s3212_s1  ;;  %v3074_v35 = vpop.eup %3073 }
0x110b   :  { %v1040_v36 = vadd.f32 1.0, %v3074_v35 }
0x110d   :  { %3075 = vrcp.f32 %v1040_v36 }
0x1117   :  { %v3076_v37 = vpop.eup %3075 }
0x1118   :  { %v1047_v49 = vmul.f32 %v3076_v37, %v949_v13 }
0x117c   :  { %v1050_v38 = vpop.permute.xlu1 %1049 }
0x117d   :  { %v1052_v39 = vmul.f32 %v3076_v37, %v1050_v38 }
0x117f   :  { %1054 = vrot.lane.b32.xlu0 %v1052_v39, %s3212_s1 }
0x11f1   :  { %v1055_v50 = vpop.permute.xlu0 %1054 }
0x11f2   :  { %v1057_v51 = vadd.f32 %v1055_v50, %v1047_v49 }
0x11f4   :  { %3077 = vtanh.f32 %v1057_v51 }
0x11f5   :  { %3079 = vpow2.f32 %v2512_v56 }
0x11fe   :  { %v3078_v55 = vpop.eup %3077 }
0x11ff   :  { %1060 = vrot.lane.b32.xlu1 %v3078_v55, %s3212_s1  ;;  %v3080_v57 = vpop.eup %3079 }
0x1200   :  { %v1041_v58 = vadd.f32 1.0, %v3080_v57 }
0x1202   :  { %3081 = vrcp.f32 %v1041_v58 }
0x120c   :  { %v3082_v59 = vpop.eup %3081 }
0x1271   :  { %v1061_v60 = vpop.permute.xlu1 %1060 }
0x1272   :  { %v1063_v61 = vmul.f32 %v3082_v59, %v1061_v60 }
0x1274   :  { %1064 = vst.msk [vmem:[#allocation2 + $0x38] sm:$0xff] %vm306_vm1, %v1063_v61 }
0x1275   :  { %1065 = vst.msk [vmem:[#allocation2] sm:$0xff] %vm308_vm2, %v1063_v61 }
0x127b   :  { %v1073_v26 = vld [vmem:[#allocation2 + $0x38] sm:$0xff] }
0x127c   :  { %v1066_v1 = vld [vmem:[#allocation2] sm:$0xff] }
0x127d   :  { %2639 = vmatprep.mubr.msk.f32.mxu1 %vm199_vm3, %v1066_v1 }
0x127e   :  { %2640 = vmatmul.mubr.msk.f32.vlgmr.msra.gmra.mrb[16].mxu1 %vm199_vm3, %v1067_v6 }
0x127f   :  { %2909 = vmatpush3.bf16.msra.mxu1 %v3504_v0  ;;  %2642 = vmatprep.mubr.msk.f32.mxu1 %vm199_vm3, %v1068_v7 }
0x1280   :  { %2910 = vmatprep.subr.bf16.mxu1 %v3213_v4 }
0x1282   :  { %2643 = vmatmul.mubr.msk.f32.gmra.mrb[18].mxu1 %vm199_vm3, %v1069_v10 }
0x1283   :  { %2645 = vmatprep.mubr.msk.f32.mxu1 %vm199_vm3, %v1070_v9  ;;  %2912 = vmatpush3.bf16.msra.mxu1 %v3516_v8 }
0x1284   :  { %2913 = vmatprep.subr.bf16.mxu1 %v3213_v4 }
0x1286   :  { %2646 = vmatmul.mubr.msk.f32.gmra.mrb[20].mxu1 %vm199_vm3, %v1071_v14 }
0x1287   :  { %2648 = vmatprep.mubr.msk.f32.mxu1 %vm199_vm3, %v1072_v18 }
0x128a   :  { %2649 = vmatmul.mubr.msk.f32.gmra.mrb[22].mxu1 %vm199_vm3, %v1073_v26 }
0x128b   :  { %2659 = vmatprep.mubr.msk.f32.mxu1 %vm3214_vm4, %v3211_v3 }
0x128e   :  { %2660 = vmatmul.mubr.f32.vlgmr.msra.gmra.mrb[24].mxu1 %v3211_v3 }
0x128f   :  { %2915 = vmatpush3.bf16.msra.mxu1 %v3504_v0  ;;  %2670 = vmatprep.mubr.msk.f32.mxu1 %vm3214_vm4, %v3211_v3 }
0x1290   :  { %2916 = vmatprep.subr.bf16.mxu1 %v3213_v4 }
0x1293   :  { %2918 = vmatpush3.bf16.msra.mxu1 %v3516_v8 }
0x1294   :  { %2919 = vmatprep.subr.bf16.mxu1 %v3213_v4 }
0x1351   :  { %v2641_v28 = vpop.f32.mrb[16].mxu1 }
0x1352   :  { %v1174_v31 = vadd.f32 %v2641_v28, %v2513_v11  ;;  %v1168_v12 = vpop.f32.mrb[17].mxu1 }
0x1353   :  { %v1169_v29 = vadd.f32 %v2513_v11, %v1168_v12 }
0x1355   :  { %v2644_v13 = vpop.f32.mrb[18].mxu1 }
0x1356   :  { %v3538_v15 = vadd.f32 %v2644_v13, %v2513_v11  ;;  %v1178_v16 = vpop.f32.mrb[19].mxu1 }
0x1357   :  { %v3540_v17 = vadd.f32 %v2513_v11, %v1178_v16 }
0x1359   :  { %v2647_v19 = vpop.f32.mrb[20].mxu1 }
0x135a   :  { %v3542_v20 = vadd.f32 %v2647_v19, %v2513_v11  ;;  %v1188_v21 = vpop.f32.mrb[21].mxu1 }
0x135b   :  { %v3544_v22 = vadd.f32 %v2513_v11, %v1188_v21 }
0x135d   :  { %v2650_v23 = vpop.f32.mrb[22].mxu1 }
0x135e   :  { %v3546_v24 = vadd.f32 %v2650_v23, %v2513_v11  ;;  %v1198_v25 = vpop.f32.mrb[23].mxu1 }
0x135f   :  { %v3548_v27 = vadd.f32 %v2513_v11, %v1198_v25 }
0x1361   :  { %v1275_v30 = vpop.f32.mrb[24].mxu1 }
0x1362   :  { %v1279_v32 = vadd.f32 %v1275_v30, %v1169_v29  ;;  %v2661_v33 = vpop.f32.mrb[25].mxu1 }
0x1364   :  { %3083 = vtanh.f32 %v1279_v32  ;;  %v2522_v35 = vmul.f32 -1.442695, %v1279_v32 }
0x1366   :  { %3085 = vpow2.f32 %v2522_v35 }
0x136e   :  { %v3084_v34 = vpop.eup %3083 }
0x136f   :  { %1289 = vrot.lane.b32.xlu0 %v3084_v34, %s3215_s12 }
0x1370   :  { %v3086_v36 = vpop.eup %3085 }
0x1371   :  { %v1283_v37 = vadd.f32 1.0, %v3086_v36 }
0x1373   :  { %3087 = vrcp.f32 %v1283_v37 }
0x137d   :  { %v3088_v38 = vpop.eup %3087 }
0x137e   :  { %v1287_v41 = vmul.f32 0.0, %v3088_v38 }
0x13e1   :  { %v1290_v39 = vpop.permute.xlu0 %1289 }
0x13e2   :  { %v1292_v40 = vmul.f32 %v3088_v38, %v1290_v39 }
0x13e4   :  { %1294 = vrot.lane.b32.xlu1 %v1292_v40, %s3215_s12 }
0x1456   :  { %v1295_v42 = vpop.permute.xlu1 %1294 }
0x1457   :  { %v1297_v43 = vadd.f32 %v1295_v42, %v1287_v41 }
0x1459   :  { %3089 = vtanh.f32 %v1297_v43 }
0x1463   :  { %v3090_v44 = vpop.eup %3089 }
0x1464   :  { %1300 = vrot.lane.b32.xlu0 %v3090_v44, %s3215_s12 }
0x14d6   :  { %v1301_v45 = vpop.permute.xlu0 %1300 }
0x14d7   :  { %v1303_v46 = vmul.f32 %v3088_v38, %v1301_v45 }
0x14d9   :  { %1305 = vrot.lane.b32.xlu1 %v1303_v46, %s3212_s1 }
0x154b   :  { %v1306_v47 = vpop.permute.xlu1 %1305 }
0x154c   :  { %1308 = vst.msk [vmem:[#allocation3] sm:$0xff] %vm306_vm1, %v1306_v47  ;;  %2671 = vmatmul.mubr.msk.f32.vlgmr.msra.gmra.mrb[26].mxu1 %vm306_vm1, %v1306_v47 }
0x154d   :  { %2921 = vmatpush3.bf16.msra.mxu1 %v3504_v0  ;;  %2681 = vmatprep.mubr.msk.f32.mxu1 %vm3214_vm4, %v3211_v3 }
0x154e   :  { %2922 = vmatprep.subr.bf16.mxu1 %v3213_v4 }
0x1551   :  { %2924 = vmatpush3.bf16.msra.mxu1 %v3516_v8 }
0x1552   :  { %2925 = vmatprep.subr.bf16.mxu1 %v3213_v4 }
0x161f   :  { %v1377_v48 = vpop.f32.mrb[26].mxu1 }
0x1620   :  { %v1381_v49 = vadd.f32 %v1377_v48, %v1174_v31  ;;  %v2672_v50 = vpop.f32.mrb[27].mxu1 }
0x1622   :  { %3091 = vtanh.f32 %v1381_v49  ;;  %v2524_v52 = vmul.f32 -1.442695, %v1381_v49 }
0x1624   :  { %3093 = vpow2.f32 %v2524_v52 }
0x162c   :  { %v3092_v51 = vpop.eup %3091 }
0x162d   :  { %1391 = vrot.lane.b32.xlu0 %v3092_v51, %s3215_s12 }
0x162e   :  { %v3094_v53 = vpop.eup %3093 }
0x162f   :  { %v1385_v54 = vadd.f32 1.0, %v3094_v53 }
0x1631   :  { %3095 = vrcp.f32 %v1385_v54 }
0x163b   :  { %v3096_v55 = vpop.eup %3095 }
0x163c   :  { %v1389_v58 = vmul.f32 %v3096_v55, %v1297_v43 }
0x169f   :  { %v1392_v56 = vpop.permute.xlu0 %1391 }
0x16a0   :  { %v1394_v57 = vmul.f32 %v3096_v55, %v1392_v56 }
0x16a2   :  { %1396 = vrot.lane.b32.xlu1 %v1394_v57, %s3215_s12 }
0x1714   :  { %v1397_v59 = vpop.permute.xlu1 %1396 }
0x1715   :  { %v1399_v60 = vadd.f32 %v1397_v59, %v1389_v58 }
0x1717   :  { %3097 = vtanh.f32 %v1399_v60 }
0x1721   :  { %v3098_v61 = vpop.eup %3097 }
0x1722   :  { %1402 = vrot.lane.b32.xlu0 %v3098_v61, %s3215_s12 }
0x1794   :  { %v1403_v62 = vpop.permute.xlu0 %1402 }
0x1795   :  { %v1405_v63 = vmul.f32 %v3096_v55, %v1403_v62 }
0x1797   :  { %1407 = vrot.lane.b32.xlu1 %v1405_v63, %s3212_s1 }
0x1809   :  { %v1408_v1 = vpop.permute.xlu1 %1407 }
0x180a   :  { %1410 = vst.msk [vmem:[#allocation3 + $0x8] sm:$0xff] %vm306_vm1, %v1408_v1  ;;  %2682 = vmatmul.mubr.msk.f32.vlgmr.msra.gmra.mrb[28].mxu1 %vm306_vm1, %v1408_v1 }
0x180b   :  { %2927 = vmatpush3.bf16.msra.mxu1 %v3504_v0  ;;  %2692 = vmatprep.mubr.msk.f32.mxu1 %vm3214_vm4, %v3211_v3 }
0x180c   :  { %2928 = vmatprep.subr.bf16.mxu1 %v3213_v4 }
0x180f   :  { %2930 = vmatpush3.bf16.msra.mxu1 %v3516_v8 }
0x1810   :  { %2931 = vmatprep.subr.bf16.mxu1 %v3213_v4 }
0x18dd   :  { %v1479_v2 = vpop.f32.mrb[28].mxu1 }
0x18de   :  { %v1483_v5 = vadd.f32 %v1479_v2, %v3540_v17  ;;  %v2683_v6 = vpop.f32.mrb[29].mxu1 }
0x18e0   :  { %3099 = vtanh.f32 %v1483_v5  ;;  %v2526_v10 = vmul.f32 -1.442695, %v1483_v5 }
0x18e2   :  { %3101 = vpow2.f32 %v2526_v10 }
0x18ea   :  { %v3100_v7 = vpop.eup %3099 }
0x18eb   :  { %1493 = vrot.lane.b32.xlu0 %v3100_v7, %s3215_s12 }
0x18ec   :  { %v3102_v9 = vpop.eup %3101 }
0x18ed   :  { %v1487_v14 = vadd.f32 1.0, %v3102_v9 }
0x18ef   :  { %3103 = vrcp.f32 %v1487_v14 }
0x18f9   :  { %v3104_v18 = vpop.eup %3103 }
0x18fa   :  { %v1491_v28 = vmul.f32 %v3104_v18, %v1399_v60 }
0x195d   :  { %v1494_v26 = vpop.permute.xlu0 %1493 }
0x195e   :  { %v1496_v11 = vmul.f32 %v3104_v18, %v1494_v26 }
0x1960   :  { %1498 = vrot.lane.b32.xlu1 %v1496_v11, %s3215_s12 }
0x19d2   :  { %v1499_v31 = vpop.permute.xlu1 %1498 }
0x19d3   :  { %v1501_v12 = vadd.f32 %v1499_v31, %v1491_v28 }
0x19d5   :  { %3105 = vtanh.f32 %v1501_v12 }
0x19df   :  { %v3106_v13 = vpop.eup %3105 }
0x19e0   :  { %1504 = vrot.lane.b32.xlu0 %v3106_v13, %s3215_s12 }
0x1a52   :  { %v1505_v16 = vpop.permute.xlu0 %1504 }
0x1a53   :  { %v1507_v17 = vmul.f32 %v3104_v18, %v1505_v16 }
0x1a55   :  { %1509 = vrot.lane.b32.xlu1 %v1507_v17, %s3212_s1 }
0x1ac7   :  { %v1510_v19 = vpop.permute.xlu1 %1509 }
0x1ac8   :  { %1512 = vst.msk [vmem:[#allocation3 + $0x10] sm:$0xff] %vm306_vm1, %v1510_v19  ;;  %2693 = vmatmul.mubr.msk.f32.vlgmr.msra.gmra.mrb[30].mxu1 %vm306_vm1, %v1510_v19 }
0x1ac9   :  { %2933 = vmatpush3.bf16.msra.mxu1 %v3504_v0  ;;  %2703 = vmatprep.mubr.msk.f32.mxu1 %vm3214_vm4, %v3211_v3 }
0x1aca   :  { %2934 = vmatprep.subr.bf16.mxu1 %v3213_v4 }
0x1acd   :  { %2936 = vmatpush3.bf16.msra.mxu1 %v3516_v8 }
0x1ace   :  { %2937 = vmatprep.subr.bf16.mxu1 %v3213_v4 }
0x1b9b   :  { %v1581_v21 = vpop.f32.mrb[30].mxu1 }
0x1b9c   :  { %v1585_v23 = vadd.f32 %v1581_v21, %v3538_v15  ;;  %v2694_v25 = vpop.f32.mrb[31].mxu1 }
0x1b9d   :  { %v55_v25 = vld [vmem:[%s3750_s2 + $0x68] sm:$0xff] }
0x1b9e   :  { %3107 = vtanh.f32 %v1585_v23  ;;  %v2528_v30 = vmul.f32 -1.442695, %v1585_v23 }
0x1ba0   :  { %3109 = vpow2.f32 %v2528_v30 }
0x1ba8   :  { %v3108_v29 = vpop.eup %3107 }
0x1ba9   :  { %1595 = vrot.lane.b32.xlu0 %v3108_v29, %s3215_s12 }
0x1baa   :  { %v3110_v32 = vpop.eup %3109 }
0x1bab   :  { %v1589_v33 = vadd.f32 1.0, %v3110_v32 }
0x1bad   :  { %3111 = vrcp.f32 %v1589_v33 }
0x1bb7   :  { %v3112_v34 = vpop.eup %3111 }
0x1bb8   :  { %v1593_v37 = vmul.f32 %v3112_v34, %v1501_v12 }
0x1c1b   :  { %v1596_v35 = vpop.permute.xlu0 %1595 }
0x1c1c   :  { %v1598_v36 = vmul.f32 %v3112_v34, %v1596_v35  ;;  %v57_v35 = vld [vmem:[%s3750_s2 + $0x78] sm:$0xff] }
0x1c1e   :  { %1600 = vrot.lane.b32.xlu1 %v1598_v36, %s3215_s12 }
0x1c90   :  { %v1601_v38 = vpop.permute.xlu1 %1600 }
0x1c91   :  { %v1603_v39 = vadd.f32 %v1601_v38, %v1593_v37  ;;  %v2023_v38 = vld [vmem:[#allocation3] sm:$0xff] }
0x1c93   :  { %3113 = vtanh.f32 %v1603_v39 }
0x1c9d   :  { %v3114_v15 = vpop.eup %3113 }
0x1c9e   :  { %1606 = vrot.lane.b32.xlu0 %v3114_v15, %s3215_s12  ;;  %v2025_v15 = vld [vmem:[#allocation3 + $0x10] sm:$0xff] }
0x1d10   :  { %v1607_v40 = vpop.permute.xlu0 %1606 }
0x1d11   :  { %v1609_v41 = vmul.f32 %v3112_v34, %v1607_v40  ;;  %v56_v34 = vld [vmem:[%s3750_s2 + $0x70] sm:$0xff] }
0x1d12   :  { %v2959_v36 = vpack.c.bf16 %v57_v35, %v56_v34 }
0x1d13   :  { %1611 = vrot.lane.b32.xlu1 %v1609_v41, %s3212_s1 }
0x1d85   :  { %v1612_v42 = vpop.permute.xlu1 %1611 }
0x1d86   :  { %1614 = vst.msk [vmem:[#allocation3 + $0x18] sm:$0xff] %vm306_vm1, %v1612_v42  ;;  %2704 = vmatmul.mubr.msk.f32.vlgmr.msra.gmra.mrb[32].mxu1 %vm306_vm1, %v1612_v42 }
0x1d87   :  { %2939 = vmatpush3.bf16.msra.mxu1 %v3504_v0  ;;  %2714 = vmatprep.mubr.msk.f32.mxu1 %vm3214_vm4, %v3211_v3 }
0x1d88   :  { %2940 = vmatprep.subr.bf16.mxu1 %v3213_v4 }
0x1d8b   :  { %2942 = vmatpush3.bf16.msra.mxu1 %v3516_v8 }
0x1d8c   :  { %2943 = vmatprep.subr.bf16.mxu1 %v3213_v4 }
0x1d8d   :  { %v2026_v40 = vld [vmem:[#allocation3 + $0x18] sm:$0xff] }
0x1e59   :  { %v1683_v43 = vpop.f32.mrb[32].mxu1 }
0x1e5a   :  { %v1687_v44 = vadd.f32 %v1683_v43, %v3544_v22  ;;  %v2705_v45 = vpop.f32.mrb[33].mxu1 }
0x1e5c   :  { %3115 = vtanh.f32 %v1687_v44  ;;  %v2530_v47 = vmul.f32 -1.442695, %v1687_v44 }
0x1e5e   :  { %3117 = vpow2.f32 %v2530_v47  ;;  %v3660_v47 = vld [vmem:[%s3750_s2 + $0x90] ss:$0 sm:$0xff] }
0x1e66   :  { %v3116_v46 = vpop.eup %3115 }
0x1e67   :  { %1697 = vrot.lane.b32.xlu0 %v3116_v46, %s3215_s12 }
0x1e68   :  { %v3118_v48 = vpop.eup %3117 }
0x1e69   :  { %v1691_v49 = vadd.f32 1.0, %v3118_v48  ;;  %v3665_v48 = vld [vmem:[%s3750_s2 + $0x88] ss:$0 sm:$0xff] }
0x1e6b   :  { %3119 = vrcp.f32 %v1691_v49 }
0x1e75   :  { %v3120_v50 = vpop.eup %3119 }
0x1e76   :  { %v1695_v53 = vmul.f32 %v3120_v50, %v1603_v39  ;;  %v2024_v39 = vld [vmem:[#allocation3 + $0x8] sm:$0xff] }
0x1ed9   :  { %v1698_v51 = vpop.permute.xlu0 %1697 }
0x1eda   :  { %v1700_v52 = vmul.f32 %v3120_v50, %v1698_v51 }
0x1edc   :  { %1702 = vrot.lane.b32.xlu1 %v1700_v52, %s3215_s12 }
0x1f4e   :  { %v1703_v54 = vpop.permute.xlu1 %1702 }
0x1f4f   :  { %v1705_v55 = vadd.f32 %v1703_v54, %v1695_v53 }
0x1f51   :  { %3121 = vtanh.f32 %v1705_v55 }
0x1f5b   :  { %v3122_v22 = vpop.eup %3121 }
0x1f5c   :  { %1708 = vrot.lane.b32.xlu0 %v3122_v22, %s3215_s12 }
0x1fce   :  { %v1709_v56 = vpop.permute.xlu0 %1708 }
0x1fcf   :  { %v1711_v57 = vmul.f32 %v3120_v50, %v1709_v56  ;;  %v2170_v50 = vmul.f32 0.0, %v3660_v47 }
0x1fd1   :  { %1713 = vrot.lane.b32.xlu1 %v1711_v57, %s3212_s1 }
0x2043   :  { %v1714_v58 = vpop.permute.xlu1 %1713 }
0x2044   :  { %1716 = vst.msk [vmem:[#allocation3 + $0x20] sm:$0xff] %vm306_vm1, %v1714_v58  ;;  %2715 = vmatmul.mubr.msk.f32.vlgmr.msra.gmra.mrb[34].mxu1 %vm306_vm1, %v1714_v58 }
0x2045   :  { %2945 = vmatpush3.bf16.msra.mxu1 %v3504_v0  ;;  %2725 = vmatprep.mubr.msk.f32.mxu1 %vm3214_vm4, %v3211_v3 }
0x2046   :  { %2946 = vmatprep.subr.bf16.mxu1 %v3213_v4 }
0x2049   :  { %2948 = vmatpush3.bf16.msra.mxu1 %v3516_v8 }
0x204a   :  { %2949 = vmatprep.subr.bf16.mxu1 %v3213_v4 }
0x204b   :  { %v2027_v41 = vld [vmem:[#allocation3 + $0x20] sm:$0xff] }
0x2117   :  { %v1785_v59 = vpop.f32.mrb[34].mxu1 }
0x2118   :  { %v1789_v60 = vadd.f32 %v1785_v59, %v3542_v20  ;;  %v2716_v61 = vpop.f32.mrb[35].mxu1 }
0x211a   :  { %3123 = vtanh.f32 %v1789_v60  ;;  %v2532_v63 = vmul.f32 -1.442695, %v1789_v60 }
0x211c   :  { %3125 = vpow2.f32 %v2532_v63 }
0x2124   :  { %v3124_v62 = vpop.eup %3123 }
0x2125   :  { %1799 = vrot.lane.b32.xlu0 %v3124_v62, %s3215_s12 }
0x2126   :  { %v3126_v1 = vpop.eup %3125 }
0x2127   :  { %v1793_v2 = vadd.f32 1.0, %v3126_v1 }
0x2129   :  { %3127 = vrcp.f32 %v1793_v2 }
0x2133   :  { %v3128_v5 = vpop.eup %3127 }
0x2134   :  { %v1797_v10 = vmul.f32 %v3128_v5, %v1705_v55 }
0x2197   :  { %v1800_v6 = vpop.permute.xlu0 %1799 }
0x2198   :  { %v1802_v7 = vmul.f32 %v3128_v5, %v1800_v6 }
0x219a   :  { %1804 = vrot.lane.b32.xlu1 %v1802_v7, %s3215_s12 }
0x220c   :  { %v1805_v9 = vpop.permute.xlu1 %1804 }
0x220d   :  { %v1807_v14 = vadd.f32 %v1805_v9, %v1797_v10 }
0x220f   :  { %3129 = vtanh.f32 %v1807_v14 }
0x2219   :  { %v3130_v20 = vpop.eup %3129 }
0x221a   :  { %1810 = vrot.lane.b32.xlu0 %v3130_v20, %s3215_s12 }
0x228c   :  { %v1811_v18 = vpop.permute.xlu0 %1810 }
0x228d   :  { %v1813_v26 = vmul.f32 %v3128_v5, %v1811_v18  ;;  %v3216_v5 = vmov 64  }
0x228e   :  { %2985 = vset.pattern.permute.xlu1 %v3216_v5  ;;  %2986 = vset.pattern.permute.xlu0 %v3216_v5 }
0x228f   :  { %1815 = vrot.lane.b32.xlu1 %v1813_v26, %s3212_s1 }
0x2301   :  { %v1816_v11 = vpop.permute.xlu1 %1815 }
0x2302   :  { %1818 = vst.msk [vmem:[#allocation3 + $0x28] sm:$0xff] %vm306_vm1, %v1816_v11  ;;  %2726 = vmatmul.mubr.msk.f32.vlgmr.msra.gmra.mrb[36].mxu1 %vm306_vm1, %v1816_v11 }
0x2303   :  { %2951 = vmatpush3.bf16.msra.mxu1 %v3504_v0  ;;  %2736 = vmatprep.mubr.msk.f32.mxu1 %vm3214_vm4, %v3211_v3 }
0x2304   :  { %2952 = vmatprep.subr.bf16.mxu1 %v3213_v4 }
0x2307   :  { %2954 = vmatpush3.bf16.msra.mxu1 %v3516_v8 }
0x2309   :  { %v2028_v42 = vld [vmem:[#allocation3 + $0x28] sm:$0xff] }
0x23d5   :  { %v1887_v28 = vpop.f32.mrb[36].mxu1 }
0x23d6   :  { %v1891_v31 = vadd.f32 %v1887_v28, %v3548_v27  ;;  %v2727_v12 = vpop.f32.mrb[37].mxu1  ;;  %v54_v27 = vld [vmem:[%s3750_s2 + $0x60] sm:$0xff] }
0x23d7   :  { %v2955_v29 = vpack.c.bf16 %v55_v25, %v54_v27 }
0x23d8   :  { %3131 = vtanh.f32 %v1891_v31  ;;  %v2534_v16 = vmul.f32 -1.442695, %v1891_v31 }
0x23d9   :  { %2956 = vmatprep.subr.bf16.mxu1 %v2955_v29 }
0x23da   :  { %3133 = vpow2.f32 %v2534_v16 }
0x23e2   :  { %v3132_v13 = vpop.eup %3131 }
0x23e3   :  { %1901 = vrot.lane.b32.xlu0 %v3132_v13, %s3215_s12 }
0x23e4   :  { %v3134_v17 = vpop.eup %3133 }
0x23e5   :  { %v1895_v19 = vadd.f32 1.0, %v3134_v17 }
0x23e7   :  { %3135 = vrcp.f32 %v1895_v19 }
0x23f1   :  { %v3136_v0 = vpop.eup %3135 }
0x23f2   :  { %v1899_v4 = vmul.f32 %v3136_v0, %v1807_v14 }
0x2455   :  { %v1902_v21 = vpop.permute.xlu0 %1901 }
0x2456   :  { %v1904_v3 = vmul.f32 %v3136_v0, %v1902_v21 }
0x2458   :  { %1906 = vrot.lane.b32.xlu1 %v1904_v3, %s3215_s12 }
0x24ca   :  { %v1907_v8 = vpop.permute.xlu1 %1906 }
0x24cb   :  { %v3628_v23 = vadd.f32 %v1907_v8, %v1899_v4 }
0x24cd   :  { %3137 = vtanh.f32 %v3628_v23 }
0x24d7   :  { %v3138_v30 = vpop.eup %3137 }
0x24d8   :  { %1912 = vrot.lane.b32.xlu0 %v3138_v30, %s3215_s12 }
0x254a   :  { %v1913_v32 = vpop.permute.xlu0 %1912 }
0x254b   :  { %v1915_v33 = vmul.f32 %v3136_v0, %v1913_v32 }
0x254d   :  { %1917 = vrot.lane.b32.xlu1 %v1915_v33, %s3212_s1 }
0x25bf   :  { %v1918_v37 = vpop.permute.xlu1 %1917 }
0x25c0   :  { %1920 = vst.msk [vmem:[#allocation3 + $0x30] sm:$0xff] %vm306_vm1, %v1918_v37  ;;  %2737 = vmatmul.mubr.msk.f32.vlgmr.msra.gmra.mrb[38].mxu1 %vm306_vm1, %v1918_v37 }
0x25c1   :  { %2958 = vmatpush3.bf16.msra.mxu1 %v2955_v29  ;;  %2747 = vmatprep.mubr.msk.f32.mxu1 %vm306_vm1, %v2023_v38 }
0x25c2   :  { %2960 = vmatprep.subr.bf16.mxu1 %v2959_v36 }
0x25c5   :  { %2962 = vmatpush3.bf16.msra.mxu1 %v2959_v36 }
0x25c7   :  { %v2029_v43 = vld [vmem:[#allocation3 + $0x30] sm:$0xff] }
0x25c8   :  { %2748 = vmatmul.mubr.msk.f32.vlgmr.msra.gmra.mrb[40].mxu1 %vm306_vm1, %v2024_v39 }
0x25c9   :  { %2750 = vmatprep.mubr.msk.f32.mxu1 %vm306_vm1, %v2025_v15 }
0x25cc   :  { %2751 = vmatmul.mubr.msk.f32.gmra.mrb[42].mxu1 %vm306_vm1, %v2026_v40 }
0x25cd   :  { %2753 = vmatprep.mubr.msk.f32.mxu1 %vm306_vm1, %v2027_v41 }
0x25d0   :  { %2754 = vmatmul.mubr.msk.f32.gmra.mrb[44].mxu1 %vm306_vm1, %v2028_v42 }
0x25d1   :  { %2756 = vmatprep.mubr.msk.f32.mxu1 %vm306_vm1, %v2029_v43 }
0x2693   :  { %v1989_v44 = vpop.f32.mrb[38].mxu1 }
0x2694   :  { %v3655_v45 = vadd.f32 %v1989_v44, %v3546_v24  ;;  %v2738_v46 = vpop.f32.mrb[39].mxu1 }
0x269b   :  { %v2749_v49 = vpop.f32.mrb[40].mxu1 }
0x269c   :  { %v2125_v51 = vpop.f32.mrb[41].mxu1  ;;  %v2131_v14 = vadd.f32 %v2749_v49, %v3665_v48 }
0x269d   :  { %v2126_v52 = vadd.f32 %v3665_v48, %v2125_v51 }
0x269f   :  { %v2171_v53 = vadd.f32 %v2170_v50, %v2126_v52  ;;  %v3669_v24 = vpop.f32.mrb[42].mxu1 }
0x26a0   :  { %v2135_v54 = vpop.f32.mrb[43].mxu1  ;;  %v2141_v44 = vadd.f32 %v3669_v24, %v3665_v48 }
0x26a1   :  { %3139 = vtanh.f32 %v2171_v53  ;;  %v2547_v57 = vmul.f32 -1.442695, %v2171_v53  ;;  %v2136_v27 = vadd.f32 %v3665_v48, %v2135_v54 }
0x26a3   :  { %v3671_v55 = vpop.f32.mrb[44].mxu1  ;;  %3141 = vpow2.f32 %v2547_v57 }
0x26a4   :  { %v3673_v22 = vpop.f32.mrb[45].mxu1 }
0x26ab   :  { %v3140_v56 = vpop.eup %3139 }
0x26ac   :  { %2181 = vrot.lane.b32.xlu0 %v3140_v56, %s3215_s12 }
0x26ad   :  { %v3142_v58 = vpop.eup %3141 }
0x26ae   :  { %v2175_v59 = vadd.f32 1.0, %v3142_v58 }
0x26b0   :  { %3143 = vrcp.f32 %v2175_v59 }
0x26ba   :  { %v3144_v60 = vpop.eup %3143 }
0x26bb   :  { %v2179_v63 = vmul.f32 0.0, %v3144_v60 }
0x271e   :  { %v2182_v61 = vpop.permute.xlu0 %2181 }
0x271f   :  { %v2184_v62 = vmul.f32 %v3144_v60, %v2182_v61 }
0x2721   :  { %2186 = vrot.lane.b32.xlu1 %v2184_v62, %s3215_s12 }
0x2793   :  { %v2187_v1 = vpop.permute.xlu1 %2186 }
0x2794   :  { %v2189_v2 = vadd.f32 %v2187_v1, %v2179_v63  ;;  %v2536_v1 = vmul.f32 -1.442695, %v3655_v45 }
0x2796   :  { %3145 = vtanh.f32 %v2189_v2 }
0x27a0   :  { %v3146_v6 = vpop.eup %3145 }
0x27a1   :  { %2192 = vrot.lane.b32.xlu0 %v3146_v6, %s3215_s12 }
0x2813   :  { %v2193_v7 = vpop.permute.xlu0 %2192 }
0x2814   :  { %v3678_v10 = vmul.f32 %v3144_v60, %v2193_v7  ;;  %v2146_v7 = vadd.f32 %v3665_v48, %v3673_v22 }
0x2816   :  { %2206 = vperm.xlu1 %2985, %v3678_v10  }
0x2895   :  { %v2207_v9 = vpop.permute.xlu1 %2206 }
0x2896   :  { %v2209_v20 = vmul.f32 %v3660_v47, %v2207_v9 }
0x2898   :  { %v2210_v18 = vadd.f32 %v2209_v20, %v2131_v14 }
0x289a   :  { %3147 = vtanh.f32 %v2210_v18  ;;  %v2548_v11 = vmul.f32 -1.442695, %v2210_v18 }
0x289c   :  { %3149 = vpow2.f32 %v2548_v11 }
0x28a4   :  { %v3148_v26 = vpop.eup %3147 }
0x28a5   :  { %2220 = vrot.lane.b32.xlu0 %v3148_v26, %s3215_s12 }
0x28a6   :  { %v3150_v28 = vpop.eup %3149 }
0x28a7   :  { %v2214_v31 = vadd.f32 1.0, %v3150_v28 }
0x28a9   :  { %3151 = vrcp.f32 %v2214_v31 }
0x28b3   :  { %v3152_v12 = vpop.eup %3151 }
0x28b4   :  { %v2218_v17 = vmul.f32 %v3152_v12, %v2189_v2 }
0x2917   :  { %v2221_v13 = vpop.permute.xlu0 %2220 }
0x2918   :  { %v2223_v16 = vmul.f32 %v3152_v12, %v2221_v13 }
0x291a   :  { %2225 = vrot.lane.b32.xlu1 %v2223_v16, %s3215_s12 }
0x298c   :  { %v2226_v19 = vpop.permute.xlu1 %2225 }
0x298d   :  { %v2228_v0 = vadd.f32 %v2226_v19, %v2218_v17 }
0x298f   :  { %3153 = vtanh.f32 %v2228_v0 }
0x2999   :  { %v3154_v21 = vpop.eup %3153 }
0x299a   :  { %2231 = vrot.lane.b32.xlu0 %v3154_v21, %s3215_s12 }
0x2a0c   :  { %v2232_v3 = vpop.permute.xlu0 %2231 }
0x2a0d   :  { %v3686_v4 = vmul.f32 %v3152_v12, %v2232_v3 }
0x2a0f   :  { %2245 = vperm.xlu1 %2985, %v3686_v4  }
0x2a8e   :  { %v2246_v8 = vpop.permute.xlu1 %2245 }
0x2a8f   :  { %v2248_v25 = vmul.f32 %v3660_v47, %v2246_v8 }
0x2a91   :  { %v2249_v29 = vadd.f32 %v2248_v25, %v2136_v27 }
0x2a93   :  { %3155 = vtanh.f32 %v2249_v29  ;;  %v2549_v32 = vmul.f32 -1.442695, %v2249_v29 }
0x2a95   :  { %3157 = vpow2.f32 %v2549_v32 }
0x2a9d   :  { %v3156_v30 = vpop.eup %3155 }
0x2a9e   :  { %2259 = vrot.lane.b32.xlu0 %v3156_v30, %s3215_s12 }
0x2a9f   :  { %v3158_v33 = vpop.eup %3157 }
0x2aa0   :  { %v2253_v34 = vadd.f32 1.0, %v3158_v33 }
0x2aa2   :  { %3159 = vrcp.f32 %v2253_v34 }
0x2aac   :  { %v3160_v35 = vpop.eup %3159 }
0x2aad   :  { %v2257_v38 = vmul.f32 %v3160_v35, %v2228_v0 }
0x2b10   :  { %v2260_v36 = vpop.permute.xlu0 %2259 }
0x2b11   :  { %v2262_v37 = vmul.f32 %v3160_v35, %v2260_v36 }
0x2b13   :  { %2264 = vrot.lane.b32.xlu1 %v2262_v37, %s3215_s12 }
0x2b85   :  { %v2265_v39 = vpop.permute.xlu1 %2264 }
0x2b86   :  { %v2267_v15 = vadd.f32 %v2265_v39, %v2257_v38 }
0x2b88   :  { %3161 = vtanh.f32 %v2267_v15 }
0x2b92   :  { %v3162_v40 = vpop.eup %3161 }
0x2b93   :  { %2270 = vrot.lane.b32.xlu0 %v3162_v40, %s3215_s12 }
0x2c05   :  { %v2271_v41 = vpop.permute.xlu0 %2270 }
0x2c06   :  { %v3694_v42 = vmul.f32 %v3160_v35, %v2271_v41  ;;  %v2151_v35 = vadd.f32 %v3671_v55, %v3665_v48 }
0x2c08   :  { %2284 = vperm.xlu1 %2985, %v3694_v42  }
0x2c87   :  { %v2285_v43 = vpop.permute.xlu1 %2284 }
0x2c88   :  { %v2287_v46 = vmul.f32 %v3660_v47, %v2285_v43 }
0x2c8a   :  { %v2288_v49 = vadd.f32 %v2287_v46, %v2141_v44 }
0x2c8c   :  { %3163 = vtanh.f32 %v2288_v49  ;;  %v2550_v51 = vmul.f32 -1.442695, %v2288_v49 }
0x2c8e   :  { %3165 = vpow2.f32 %v2550_v51 }
0x2c96   :  { %v3164_v50 = vpop.eup %3163 }
0x2c97   :  { %2298 = vrot.lane.b32.xlu0 %v3164_v50, %s3215_s12 }
0x2c98   :  { %v3166_v52 = vpop.eup %3165 }
0x2c99   :  { %v2292_v53 = vadd.f32 1.0, %v3166_v52 }
0x2c9b   :  { %3167 = vrcp.f32 %v2292_v53 }
0x2ca5   :  { %v3168_v54 = vpop.eup %3167 }
0x2ca6   :  { %v2296_v58 = vmul.f32 %v3168_v54, %v2267_v15 }
0x2d09   :  { %v2299_v56 = vpop.permute.xlu0 %2298 }
0x2d0a   :  { %v2301_v57 = vmul.f32 %v3168_v54, %v2299_v56 }
0x2d0c   :  { %2303 = vrot.lane.b32.xlu1 %v2301_v57, %s3215_s12 }
0x2d7e   :  { %v2304_v59 = vpop.permute.xlu1 %2303 }
0x2d7f   :  { %v2306_v24 = vadd.f32 %v2304_v59, %v2296_v58 }
0x2d81   :  { %3169 = vtanh.f32 %v2306_v24 }
0x2d82   :  { %3171 = vtanh.f32 %v3655_v45 }
0x2d83   :  { %3173 = vpow2.f32 %v2536_v1 }
0x2d8b   :  { %v3170_v60 = vpop.eup %3169 }
0x2d8c   :  { %2309 = vrot.lane.b32.xlu0 %v3170_v60, %s3215_s12  ;;  %v3172_v63 = vpop.eup %3171 }
0x2d8d   :  { %v3174_v2 = vpop.eup %3173 }
0x2d8e   :  { %v1997_v5 = vadd.f32 1.0, %v3174_v2 }
0x2d90   :  { %3175 = vrcp.f32 %v1997_v5 }
0x2d9a   :  { %v3176_v20 = vpop.eup %3175 }
0x2d9b   :  { %v2001_v12 = vmul.f32 %v3176_v20, %v3628_v23 }
0x2dfe   :  { %v2310_v61 = vpop.permute.xlu0 %2309 }
0x2dff   :  { %v3704_v62 = vmul.f32 %v3168_v54, %v2310_v61 }
0x2e01   :  { %2323 = vperm.xlu1 %2985, %v3704_v62  }
0x2e05   :  { %2003 = vrot.lane.b32.xlu1 %v3172_v63, %s3215_s12 }
0x2e80   :  { %v2324_v6 = vpop.permute.xlu1 %2323 }
0x2e81   :  { %v2326_v9 = vmul.f32 %v3660_v47, %v2324_v6 }
0x2e83   :  { %v2327_v14 = vadd.f32 %v2326_v9, %v2146_v7 }
0x2e84   :  { %v2004_v18 = vpop.permute.xlu1 %2003 }
0x2e85   :  { %3177 = vtanh.f32 %v2327_v14  ;;  %v2006_v26 = vmul.f32 %v3176_v20, %v2004_v18  ;;  %v2551_v45 = vmul.f32 -1.442695, %v2327_v14 }
0x2e87   :  { %2008 = vrot.lane.b32.xlu1 %v2006_v26, %s3215_s12  ;;  %3179 = vpow2.f32 %v2551_v45 }
0x2e8f   :  { %v3178_v11 = vpop.eup %3177 }
0x2e90   :  { %2337 = vrot.lane.b32.xlu0 %v3178_v11, %s3215_s12 }
0x2e91   :  { %v3180_v28 = vpop.eup %3179 }
0x2e92   :  { %v2331_v31 = vadd.f32 1.0, %v3180_v28 }
0x2e94   :  { %3181 = vrcp.f32 %v2331_v31 }
0x2e9e   :  { %v3182_v16 = vpop.eup %3181 }
0x2e9f   :  { %v2335_v21 = vmul.f32 %v3182_v16, %v2306_v24 }
0x2ef9   :  { %v2009_v22 = vpop.permute.xlu1 %2008 }
0x2efa   :  { %v2011_v13 = vadd.f32 %v2009_v22, %v2001_v12 }
0x2efc   :  { %3183 = vtanh.f32 %v2011_v13 }
0x2f02   :  { %v2338_v17 = vpop.permute.xlu0 %2337 }
0x2f03   :  { %v2340_v19 = vmul.f32 %v3182_v16, %v2338_v17 }
0x2f05   :  { %2342 = vrot.lane.b32.xlu0 %v2340_v19, %s3215_s12 }
0x2f06   :  { %v3184_v0 = vpop.eup %3183 }
0x2f07   :  { %2014 = vrot.lane.b32.xlu1 %v3184_v0, %s3215_s12  ;;  %v2196_v0 = vmax.f32 %v3678_v10, 0.0  ;;  %v2313_v10 = vmax.f32 %v3704_v62, 0.0 }
0x2f77   :  { %v2343_v3 = vpop.permute.xlu0 %2342 }
0x2f78   :  { %v2345_v8 = vadd.f32 %v2343_v3, %v2335_v21 }
0x2f79   :  { %v2015_v27 = vpop.permute.xlu1 %2014 }
0x2f7a   :  { %3185 = vtanh.f32 %v2345_v8  ;;  %v2017_v25 = vmul.f32 %v3176_v20, %v2015_v27 }
0x2f7c   :  { %2019 = vrot.lane.b32.xlu1 %v2017_v25, %s3212_s1 }
0x2f84   :  { %v3186_v23 = vpop.eup %3185 }
0x2f85   :  { %2348 = vrot.lane.b32.xlu0 %v3186_v23, %s3215_s12  ;;  %v2235_v23 = vmax.f32 %v3686_v4, 0.0 }
0x2fee   :  { %v2020_v29 = vpop.permute.xlu1 %2019 }
0x2fef   :  { %2022 = vst.msk [vmem:[#allocation3 + $0x38] sm:$0xff] %vm306_vm1, %v2020_v29 }
0x2ff6   :  { %v2030_v30 = vld [vmem:[#allocation3 + $0x38] sm:$0xff] }
0x2ff7   :  { %v2349_v32 = vpop.permute.xlu0 %2348  ;;  %2757 = vmatmul.mubr.msk.f32.gmra.mrb[46].mxu1 %vm306_vm1, %v2030_v30 }
0x2ff8   :  { %v3721_v33 = vmul.f32 %v3182_v16, %v2349_v32 }
0x2ffa   :  { %2362 = vperm.xlu0 %2986, %v3721_v33  }
0x3079   :  { %v2363_v34 = vpop.permute.xlu0 %2362 }
0x307a   :  { %v2365_v36 = vmul.f32 %v3660_v47, %v2363_v34 }
0x307c   :  { %v2366_v37 = vadd.f32 %v2365_v36, %v2151_v35 }
0x307e   :  { %3187 = vtanh.f32 %v2366_v37  ;;  %v2552_v40 = vmul.f32 -1.442695, %v2366_v37 }
0x3080   :  { %3189 = vpow2.f32 %v2552_v40 }
0x3088   :  { %v3188_v38 = vpop.eup %3187 }
0x3089   :  { %2376 = vrot.lane.b32.xlu1 %v3188_v38, %s3215_s12 }
0x308a   :  { %v3190_v41 = vpop.eup %3189 }
0x308b   :  { %v2370_v43 = vadd.f32 1.0, %v3190_v41 }
0x308d   :  { %3191 = vrcp.f32 %v2370_v43 }
0x3097   :  { %v3192_v44 = vpop.eup %3191 }
0x3098   :  { %v2374_v55 = vmul.f32 %v3192_v44, %v2345_v8 }
0x30ca   :  { %v2758_v39 = vpop.f32.mrb[46].mxu1 }
0x30cb   :  { %v2155_v15 = vpop.f32.mrb[47].mxu1  ;;  %v2161_v11 = vadd.f32 %v2758_v39, %v3665_v48 }
0x30cc   :  { %v2156_v57 = vadd.f32 %v3665_v48, %v2155_v15  ;;  %v2352_v48 = vmax.f32 %v3721_v33, 0.0  ;;  %v2164_v33 = vlaneseq }
0x30ce   :  { %v2165_v34 = vand.u32 127, %v2164_v33 }
0x30d0   :  { %vm2202_vm5 = vcmp.eq.s32.totalorder %v2165_v34, 0  ;;  %vm2241_vm6 = vcmp.eq.s32.totalorder %v2165_v34, 1  ;;  %vm2280_vm7 = vcmp.eq.s32.totalorder %v2165_v34, 2  ;;  %vm2319_vm8 = vcmp.eq.s32.totalorder %v2165_v34, 3 }
0x30d1   :  { %vm2358_vm9 = vcmp.eq.s32.totalorder %v2165_v34, 4  ;;  %vm2397_vm10 = vcmp.eq.s32.totalorder %v2165_v34, 5  ;;  %vm2436_vm11 = vcmp.eq.s32.totalorder %v2165_v34, 6  ;;  %vm2475_vm12 = vcmp.eq.s32.totalorder %v2165_v34, 7 }
0x30fb   :  { %v2377_v46 = vpop.permute.xlu1 %2376 }
0x30fc   :  { %v2379_v49 = vmul.f32 %v3192_v44, %v2377_v46 }
0x30fe   :  { %2381 = vrot.lane.b32.xlu0 %v2379_v49, %s3215_s12 }
0x3170   :  { %v2382_v50 = vpop.permute.xlu0 %2381 }
0x3171   :  { %v2384_v51 = vadd.f32 %v2382_v50, %v2374_v55 }
0x3173   :  { %3193 = vtanh.f32 %v2384_v51 }
0x317d   :  { %v3194_v52 = vpop.eup %3193 }
0x317e   :  { %2387 = vrot.lane.b32.xlu1 %v3194_v52, %s3215_s12 }
0x31f0   :  { %v2388_v53 = vpop.permute.xlu1 %2387 }
0x31f1   :  { %v2390_v54 = vmul.f32 %v3192_v44, %v2388_v53 }
0x31f3   :  { %2401 = vperm.xlu0 %2986, %v2390_v54  }
0x3272   :  { %v2402_v56 = vpop.permute.xlu0 %2401 }
0x3273   :  { %v2404_v58 = vmul.f32 %v3660_v47, %v2402_v56 }
0x3275   :  { %v2405_v59 = vadd.f32 %v2404_v58, %v2156_v57 }
0x3277   :  { %3195 = vtanh.f32 %v2405_v59  ;;  %v2553_v60 = vmul.f32 -1.442695, %v2405_v59 }
0x3279   :  { %3197 = vpow2.f32 %v2553_v60 }
0x3281   :  { %v3196_v24 = vpop.eup %3195 }
0x3282   :  { %2415 = vrot.lane.b32.xlu1 %v3196_v24, %s3215_s12 }
0x3283   :  { %v3198_v61 = vpop.eup %3197 }
0x3284   :  { %v2409_v63 = vadd.f32 1.0, %v3198_v61 }
0x3286   :  { %3199 = vrcp.f32 %v2409_v63 }
0x3290   :  { %v3200_v1 = vpop.eup %3199 }
0x3291   :  { %v2413_v6 = vmul.f32 %v3200_v1, %v2384_v51 }
0x32f4   :  { %v2416_v2 = vpop.permute.xlu1 %2415 }
0x32f5   :  { %v2418_v5 = vmul.f32 %v3200_v1, %v2416_v2 }
0x32f7   :  { %2420 = vrot.lane.b32.xlu0 %v2418_v5, %s3215_s12 }
0x3369   :  { %v2421_v7 = vpop.permute.xlu0 %2420 }
0x336a   :  { %v2423_v9 = vadd.f32 %v2421_v7, %v2413_v6 }
0x336c   :  { %3201 = vtanh.f32 %v2423_v9 }
0x3376   :  { %v3202_v14 = vpop.eup %3201 }
0x3377   :  { %2426 = vrot.lane.b32.xlu1 %v3202_v14, %s3215_s12 }
0x33e9   :  { %v2427_v20 = vpop.permute.xlu1 %2426 }
0x33ea   :  { %v2429_v18 = vmul.f32 %v3200_v1, %v2427_v20 }
0x33ec   :  { %2440 = vperm.xlu0 %2986, %v2429_v18   ;;  %v2430_v21 = vmax.f32 %v2429_v18, 0.0 }
0x346b   :  { %v2441_v26 = vpop.permute.xlu0 %2440 }
0x346c   :  { %v2443_v45 = vmul.f32 %v3660_v47, %v2441_v26  ;;  %v2274_v47 = vmax.f32 %v3694_v42, 0.0  ;;  %v2391_v42 = vmax.f32 %v2390_v54, 0.0 }
0x346e   :  { %v2444_v28 = vadd.f32 %v2443_v45, %v2161_v11 }
0x3470   :  { %3203 = vtanh.f32 %v2444_v28  ;;  %v2554_v12 = vmul.f32 -1.442695, %v2444_v28 }
0x3472   :  { %3205 = vpow2.f32 %v2554_v12 }
0x347a   :  { %v3204_v31 = vpop.eup %3203 }
0x347b   :  { %2454 = vrot.lane.b32.xlu1 %v3204_v31, %s3215_s12 }
0x347c   :  { %v3206_v22 = vpop.eup %3205 }
0x347d   :  { %v2448_v13 = vadd.f32 1.0, %v3206_v22 }
0x347f   :  { %3207 = vrcp.f32 %v2448_v13 }
0x3489   :  { %v3208_v16 = vpop.eup %3207 }
0x348a   :  { %v2452_v3 = vmul.f32 %v3208_v16, %v2423_v9 }
0x34ed   :  { %v2455_v17 = vpop.permute.xlu1 %2454 }
0x34ee   :  { %v2457_v19 = vmul.f32 %v3208_v16, %v2455_v17 }
0x34f0   :  { %2459 = vrot.lane.b32.xlu0 %v2457_v19, %s3215_s12 }
0x34f4   :  { %2199 = vperm.xlu0 %2986, %v2196_v0  }
0x34f8   :  { %2277 = vperm.xlu0 %2986, %v2274_v47  }
0x34fc   :  { %2355 = vperm.xlu0 %2986, %v2352_v48  }
0x3500   :  { %2433 = vperm.xlu0 %2986, %v2430_v21  }
0x3562   :  { %v2460_v8 = vpop.permute.xlu0 %2459 }
0x3563   :  { %v2462_v27 = vadd.f32 %v2460_v8, %v2452_v3 }
0x3565   :  { %3209 = vtanh.f32 %v2462_v27 }
0x356f   :  { %v3210_v25 = vpop.eup %3209 }
0x3570   :  { %2465 = vrot.lane.b32.xlu1 %v3210_v25, %s3215_s12 }
0x3573   :  { %v2200_v35 = vpop.permute.xlu0 %2199 }
0x3574   :  { %2238 = vperm.xlu1 %2985, %v2235_v23   ;;  %v2203_v38 = vsel %vm2202_vm5, %v2200_v35, 0.0 }
0x3577   :  { %v2278_v37 = vpop.permute.xlu0 %2277 }
0x3578   :  { %2316 = vperm.xlu1 %2985, %v2313_v10  }
0x357b   :  { %v2356_v15 = vpop.permute.xlu0 %2355 }
0x357c   :  { %2394 = vperm.xlu1 %2985, %v2391_v42  }
0x357f   :  { %v2434_v46 = vpop.permute.xlu0 %2433 }
0x35e2   :  { %v2466_v29 = vpop.permute.xlu1 %2465 }
0x35e3   :  { %v2468_v30 = vmul.f32 %v3208_v16, %v2466_v29 }
0x35e5   :  { %v2469_v32 = vmax.f32 %v2468_v30, 0.0 }
0x35e7   :  { %2472 = vperm.xlu1 %2985, %v2469_v32  }
0x35f3   :  { %v2239_v36 = vpop.permute.xlu1 %2238 }
0x35f4   :  { %v2242_v4 = vsel %vm2241_vm6, %v2239_v36, %v2203_v38 }
0x35f5   :  { %v2281_v62 = vsel %vm2280_vm7, %v2278_v37, %v2242_v4 }
0x35f7   :  { %v2317_v39 = vpop.permute.xlu1 %2316 }
0x35f8   :  { %v2320_v40 = vsel %vm2319_vm8, %v2317_v39, %v2281_v62 }
0x35f9   :  { %v2359_v43 = vsel %vm2358_vm9, %v2356_v15, %v2320_v40 }
0x35fb   :  { %v2395_v41 = vpop.permute.xlu1 %2394 }
0x35fc   :  { %v2398_v44 = vsel %vm2397_vm10, %v2395_v41, %v2359_v43 }
0x35fd   :  { %v2437_v55 = vsel %vm2436_vm11, %v2434_v46, %v2398_v44 }
0x3666   :  { %v2473_v49 = vpop.permute.xlu1 %2472 }
0x3667   :  { %v2476_v50 = vsel %vm2475_vm12, %v2473_v49, %v2437_v55 }
0x3668   :  { %2477 = vst [vmem:[%s3751_s3] sm:$0xff] %v2476_v50 }

</bundles_post_ra>
